<compile_context>
chip_gen: v7x
topology: tpu7x:2x2x1
jax: 0.10.0
libtpu: 0.0.40
codegen_flags: <defaults>
</compile_context>

<pallas_src>
import functools

import numpy as np
import jax
import jax.numpy as jnp
from jax.experimental import pallas as pl
from jax.experimental.pallas import tpu as pltpu

EPS = 1e-5


def _vmem_limit_bytes():
    """~3/4 of this generation's VMEM, capped at 96 MiB, floor 32 MiB."""
    cap = 64 * 1024 * 1024
    try:
        info = pltpu.get_tpu_info()
        cap = int(getattr(info, "vmem_capacity_bytes", cap))
    except Exception:
        pass
    return max(32 * 1024 * 1024, min((cap * 3) // 4, 96 * 1024 * 1024))


# --------------------------------------------------------------------------
# Pallas kernels
# --------------------------------------------------------------------------

def _conv_taps_kernel(*refs, offsets, pre_affine, with_skip):
    """3x3 stride-1 conv as ONE long-K MXU matmul over a lane-haloed slab.

    The 9 lane-shifted tap views are stacked along K and multiplied by the
    (Cout, 9*Cact) weight in a single dot, so accumulation stays in the MXU.
    Fused in the same pass: optional BN+ReLU "pre-affine" on the input slab
    (applies bn1/relu to conv1's raw output on the fly), masked per-channel
    sum / sum-of-squares partials for this conv's BatchNorm, and an optional
    1x1 skip-conv matmul + its BN statistics.
    """
    it = iter(refs)
    xl_ref, xc_ref, xr_ref = next(it), next(it), next(it)   # act: halo|tile|halo
    if pre_affine:
        ml_ref, mc_ref, mr_ref = next(it), next(it), next(it)
    else:
        mc_ref = next(it)                                    # interior mask
    w_ref = next(it)                                         # (Cout, 9*Cact)
    if pre_affine:
        s_ref, b_ref = next(it), next(it)                    # (Cact, 1) f32
    if with_skip:
        xs_ref, ws_ref = next(it), next(it)                  # (Cskip, tM), (Cout, Cskip)
    y_ref, sum_ref, sq_ref = next(it), next(it), next(it)
    if with_skip:
        ys_ref, ssum_ref, ssq_ref = next(it), next(it), next(it)

    halo = xl_ref.shape[1]
    tile_m = xc_ref.shape[1]
    mc = mc_ref[...]

    # Lane-haloed activation slab (Cact, halo + tile_m + halo).
    x_full = jnp.concatenate([xl_ref[...], xc_ref[...], xr_ref[...]], axis=1)
    if pre_affine:
        m_full = jnp.concatenate([ml_ref[...], mc, mr_ref[...]], axis=1)
        a = jnp.maximum(x_full.astype(jnp.float32) * s_ref[...] + b_ref[...], 0.0)
        x_full = (a * m_full).astype(x_full.dtype)

    # Stack the 9 lane-shifted tap views along K -> one long-K bf16 MXU matmul
    # (f32 accumulation inside the MXU).
    x_stack = jnp.concatenate(
        [x_full[:, halo + d:halo + d + tile_m] for d in offsets], axis=0)
    acc = jnp.dot(w_ref[...], x_stack, preferred_element_type=jnp.float32)

    y_ref[...] = acc.astype(y_ref.dtype)
    ym = acc * mc                                   # mask out pad positions
    sum_ref[0] = jnp.sum(ym, axis=1, keepdims=True)
    sq_ref[0] = jnp.sum(ym * acc, axis=1, keepdims=True)

    if with_skip:
        ys = jnp.dot(ws_ref[...], xs_ref[...], preferred_element_type=jnp.float32)
        ys_ref[...] = ys.astype(ys_ref.dtype)
        ysm = ys * mc
        ssum_ref[0] = jnp.sum(ysm, axis=1, keepdims=True)
        ssq_ref[0] = jnp.sum(ysm * ys, axis=1, keepdims=True)


def _matmul_stats_kernel(p_ref, m_ref, w_ref, y_ref, sum_ref, sq_ref):
    """Plain tiled matmul (stride-2 conv1 patches) + masked BN partials."""
    y = jnp.dot(w_ref[...], p_ref[...], preferred_element_type=jnp.float32)
    y_ref[...] = y.astype(y_ref.dtype)
    ym = y * m_ref[...]
    sum_ref[0] = jnp.sum(ym, axis=1, keepdims=True)
    sq_ref[0] = jnp.sum(ym * y, axis=1, keepdims=True)


def _bn_add_relu_kernel(*refs, skip_affine):
    """out = relu(y2*scale2 + bias2 + identity[*scale_s + bias_s])."""
    if skip_affine:
        y_ref, id_ref, s_ref, b_ref, ss_ref, bs_ref, o_ref = refs
    else:
        y_ref, id_ref, s_ref, b_ref, o_ref = refs
    y = y_ref[...].astype(jnp.float32) * s_ref[...] + b_ref[...]
    ident = id_ref[...].astype(jnp.float32)
    if skip_affine:
        ident = ident * ss_ref[...] + bs_ref[...]
    o_ref[...] = jnp.maximum(y + ident, 0.0)


# --------------------------------------------------------------------------
# pallas_call wrappers
# --------------------------------------------------------------------------

def _conv3x3_call(x_p, mask_p, w_flat, wp, *, tile_m, halo,
                  affine=None, skip=None, y_dtype=jnp.bfloat16, vmem_limit):
    c_act, mpad = x_p.shape
    cout = w_flat.shape[0]
    n_tiles = mpad // tile_m
    nh = tile_m // halo
    n_hblk = mpad // halo
    offsets = [(ky - 1) * wp + (kx - 1) for ky in range(3) for kx in range(3)]
    pre_affine = affine is not None

    def left_map(i):
        return (0, jnp.maximum(i * nh - 1, 0))

    def right_map(i):
        return (0, jnp.minimum((i + 1) * nh, n_hblk - 1))

    def center_map(i):
        return (0, i)

    in_specs = [
        pl.BlockSpec((c_act, halo), left_map),
        pl.BlockSpec((c_act, tile_m), center_map),
        pl.BlockSpec((c_act, halo), right_map),
    ]
    args = [x_p, x_p, x_p]
    if pre_affine:
        # Mask halos are only needed when the pre-affine zeroes pad positions.
        in_specs += [pl.BlockSpec((1, halo), left_map),
                     pl.BlockSpec((1, tile_m), center_map),
                     pl.BlockSpec((1, halo), right_map)]
        args += [mask_p, mask_p, mask_p]
    else:
        in_specs += [pl.BlockSpec((1, tile_m), center_map)]
        args += [mask_p]
    in_specs += [pl.BlockSpec(w_flat.shape, lambda i: (0, 0))]
    args += [w_flat]
    if pre_affine:
        in_specs += [pl.BlockSpec((c_act, 1), lambda i: (0, 0)),
                     pl.BlockSpec((c_act, 1), lambda i: (0, 0))]
        args += [affine[0], affine[1]]
    if skip is not None:
        xs_p, ws = skip
        in_specs += [pl.BlockSpec((xs_p.shape[0], tile_m), center_map),
                     pl.BlockSpec(ws.shape, lambda i: (0, 0))]
        args += [xs_p, ws]

    out_shape = [jax.ShapeDtypeStruct((cout, mpad), y_dtype),
                 jax.ShapeDtypeStruct((n_tiles, cout, 1), jnp.float32),
                 jax.ShapeDtypeStruct((n_tiles, cout, 1), jnp.float32)]
    out_specs = [pl.BlockSpec((cout, tile_m), center_map),
                 pl.BlockSpec((1, cout, 1), lambda i: (i, 0, 0)),
                 pl.BlockSpec((1, cout, 1), lambda i: (i, 0, 0))]
    if skip is not None:
        out_shape += [jax.ShapeDtypeStruct((cout, mpad), jnp.bfloat16),
                      jax.ShapeDtypeStruct((n_tiles, cout, 1), jnp.float32),
                      jax.ShapeDtypeStruct((n_tiles, cout, 1), jnp.float32)]
        out_specs += [pl.BlockSpec((cout, tile_m), center_map),
                      pl.BlockSpec((1, cout, 1), lambda i: (i, 0, 0)),
                      pl.BlockSpec((1, cout, 1), lambda i: (i, 0, 0))]

    kern = functools.partial(_conv_taps_kernel, offsets=offsets,
                             pre_affine=pre_affine, with_skip=skip is not None)
    return pl.pallas_call(
        kern,
        out_shape=out_shape,
        grid=(n_tiles,),
        in_specs=in_specs,
        out_specs=out_specs,
        # Per-tile BN partials -> no cross-iteration dependency -> "parallel"
        # (shards across both TensorCores on v7x megacore).
        compiler_params=pltpu.CompilerParams(
            dimension_semantics=("parallel",),
            vmem_limit_bytes=vmem_limit),
    )(*args)


def _matmul_call(p, mask_p, w, *, tile_m, y_dtype=jnp.bfloat16, vmem_limit):
    k, mpad = p.shape
    cout = w.shape[0]
    n_tiles = mpad // tile_m
    return pl.pallas_call(
        _matmul_stats_kernel,
        out_shape=[jax.ShapeDtypeStruct((cout, mpad), y_dtype),
                   jax.ShapeDtypeStruct((n_tiles, cout, 1), jnp.float32),
                   jax.ShapeDtypeStruct((n_tiles, cout, 1), jnp.float32)],
        grid=(n_tiles,),
        in_specs=[pl.BlockSpec((k, tile_m), lambda i: (0, i)),
                  pl.BlockSpec((1, tile_m), lambda i: (0, i)),
                  pl.BlockSpec((cout, k), lambda i: (0, 0))],
        out_specs=[pl.BlockSpec((cout, tile_m), lambda i: (0, i)),
                   pl.BlockSpec((1, cout, 1), lambda i: (i, 0, 0)),
                   pl.BlockSpec((1, cout, 1), lambda i: (i, 0, 0))],
        compiler_params=pltpu.CompilerParams(
            dimension_semantics=("parallel",),
            vmem_limit_bytes=vmem_limit),
    )(p, mask_p, w)


def _bn_add_relu_call(y2, ident, s2, b2, skip_affine=None, *, tile_m, vmem_limit):
    cout, mpad = y2.shape
    n_tiles = mpad // tile_m
    args = [y2, ident, s2, b2]
    in_specs = [pl.BlockSpec((cout, tile_m), lambda i: (0, i)),
                pl.BlockSpec((ident.shape[0], tile_m), lambda i: (0, i)),
                pl.BlockSpec((cout, 1), lambda i: (0, 0)),
                pl.BlockSpec((cout, 1), lambda i: (0, 0))]
    if skip_affine is not None:
        args += [skip_affine[0], skip_affine[1]]
        in_specs += [pl.BlockSpec((cout, 1), lambda i: (0, 0)),
                     pl.BlockSpec((cout, 1), lambda i: (0, 0))]
    kern = functools.partial(_bn_add_relu_kernel,
                             skip_affine=skip_affine is not None)
    return pl.pallas_call(
        kern,
        out_shape=jax.ShapeDtypeStruct((cout, mpad), jnp.float32),
        grid=(n_tiles,),
        in_specs=in_specs,
        out_specs=pl.BlockSpec((cout, tile_m), lambda i: (0, i)),
        compiler_params=pltpu.CompilerParams(
            dimension_semantics=("parallel",),
            vmem_limit_bytes=vmem_limit),
    )(*args)


# --------------------------------------------------------------------------
# Forward pass (JAX glue)
# --------------------------------------------------------------------------

def _bn_affine(s_tiles, q_tiles, gamma, beta, count):
    s = jnp.sum(s_tiles, axis=0)            # reduce per-tile partials -> (C, 1)
    q = jnp.sum(q_tiles, axis=0)
    mean = s / count
    # TODO(synk): E[x^2]-E[x]^2 can cancel when |mean| >> std; switch to a
    # shifted / two-pass accumulation if tolerances tighten.
    var = jnp.maximum(q / count - mean * mean, 0.0)
    scale = gamma.reshape(-1, 1) * jax.lax.rsqrt(var + EPS)
    bias = beta.reshape(-1, 1) - mean * scale
    return scale, bias


def resblock_tier2_forward(x, params, *, tile_m=2048):
    """x: (N, Cin, H, W) f32 -> (N, Cmid, Ho, Wo) f32.

    tile_m: lane-tile size (multiple of 128).  2048 is a good default on all
    generations (double-buffered working set stays a few MiB); it is clamped
    to the padded slab size for tiny inputs.
    """
    n, cin, h, w = x.shape
    cmid = params["w1"].shape[0]
    downsample = (cmid == 2 * cin)
    stride = 2 if downsample else 1

    # Channel dims zero-padded to multiples of 16 so every in-kernel sublane
    # concat / K-block offset is aligned to the bf16 native tile.  This is a
    # no-op for real ResNet-34 channel counts (64/128/256/512).
    cin_p = -(-cin // 16) * 16
    cmid_p = -(-cmid // 16) * 16

    ho = (h - 1) // stride + 1
    wo = (w - 1) // stride + 1
    hp, wp = ho + 2, wo + 2          # conv-output grid with zero padding in place
    mp = n * hp * wp

    halo = 128 * ((wp + 1 + 127) // 128)   # lanes needed by a +-(wp+1) tap shift
    tile_m = max(tile_m, halo)
    tile_m = halo * (tile_m // halo)       # halo must divide tile_m
    tile_m = min(tile_m, halo * (-(-mp // halo)))   # don't over-pad tiny inputs
    mpad = (-(-mp // tile_m)) * tile_m
    count = float(n * ho * wo)             # true element count for BN stats

    vmem_limit = _vmem_limit_bytes()

    def padc(a, axis, new):
        cfg = [(0, 0)] * a.ndim
        cfg[axis] = (0, new - a.shape[axis])
        return jnp.pad(a, cfg)

    w1p = padc(padc(params["w1"], 0, cmid_p), 1, cin_p)
    w2p = padc(padc(params["w2"], 0, cmid_p), 1, cmid_p)
    g1p = jnp.pad(params["g1"], (0, cmid_p - cmid), constant_values=1.0)
    b1p = padc(params["b1"], 0, cmid_p)
    g2p = jnp.pad(params["g2"], (0, cmid_p - cmid), constant_values=1.0)
    b2p = padc(params["b2"], 0, cmid_p)

    # Interior mask of the padded layout (1 at real output positions).
    row_ok = (jnp.arange(hp) >= 1) & (jnp.arange(hp) <= ho)
    col_ok = (jnp.arange(wp) >= 1) & (jnp.arange(wp) <= wo)
    mask2d = (row_ok[:, None] & col_ok[None, :]).astype(jnp.float32)
    mask_p = jnp.pad(jnp.tile(mask2d.reshape(-1), n).reshape(1, mp),
                     ((0, 0), (0, mpad - mp)))

    # Weight layout for the long-K matmul: (Cout, tap-major, channel-minor).
    w2_flat = w2p.transpose(0, 2, 3, 1).reshape(cmid_p, 9 * cmid_p)
    w2_flat = w2_flat.astype(jnp.bfloat16)

    if downsample:
        # conv1: 3x3 stride-2.  bf16 patch matrix over the *padded* output
        # grid, built channels-leading (no f32 5-D transpose materialized).
        x_bf = padc(x, 1, cin_p).astype(jnp.bfloat16)
        xq = jnp.pad(x_bf.transpose(1, 0, 2, 3), ((0, 0), (0, 0), (3, 3), (3, 3)))
        cols = [xq[:, :, ky:ky + 2 * hp:2, kx:kx + 2 * wp:2]
                for ky in range(3) for kx in range(3)]
        p1 = jnp.pad(jnp.stack(cols, axis=0).reshape(9 * cin_p, mp),
                     ((0, 0), (0, mpad - mp)))
        w1m = w1p.transpose(0, 2, 3, 1).reshape(cmid_p, 9 * cin_p)
        w1m = w1m.astype(jnp.bfloat16)
        y1_raw, s1, q1 = _matmul_call(p1, mask_p, w1m, tile_m=tile_m,
                                      y_dtype=jnp.bfloat16,
                                      vmem_limit=vmem_limit)

        # Strided-subsampled input in the same padded layout; the 1x1 stride-2
        # skip conv + its BN stats are fused into the conv2 kernel below.
        xs = jnp.pad(x_bf[:, :, ::2, ::2].transpose(1, 0, 2, 3),
                     ((0, 0), (0, 0), (1, 1), (1, 1)))
        xs_p = jnp.pad(xs.reshape(cin_p, mp), ((0, 0), (0, mpad - mp)))
        wsp = padc(padc(params["ws"], 0, cmid_p), 1, cin_p)
        wsm = wsp.reshape(cmid_p, cin_p).astype(jnp.bfloat16)
        gsp = jnp.pad(params["gs"], (0, cmid_p - cmid), constant_values=1.0)
        bsp = padc(params["bs"], 0, cmid_p)
        skip = (xs_p, wsm)
        ident_arr = None
    else:
        # conv1: 3x3 stride-1 straight off the zero-padded input slab.
        xpad = jnp.pad(padc(x, 1, cin_p), ((0, 0), (0, 0), (1, 1), (1, 1)))
        xp_flat = jnp.pad(xpad.transpose(1, 0, 2, 3).reshape(cin_p, mp),
                          ((0, 0), (0, mpad - mp)))
        xp_bf16 = xp_flat.astype(jnp.bfloat16)
        w1_flat = w1p.transpose(0, 2, 3, 1).reshape(cmid_p, 9 * cin_p)
        w1_flat = w1_flat.astype(jnp.bfloat16)
        y1_raw, s1, q1 = _conv3x3_call(xp_bf16, mask_p, w1_flat, wp,
                                       tile_m=tile_m, halo=halo,
                                       y_dtype=jnp.bfloat16,
                                       vmem_limit=vmem_limit)
        skip = None
        ident_arr = xp_flat        # identity residual (f32, same padded layout)

    scale1, bias1 = _bn_affine(s1, q1, g1p, b1p, count)

    # conv2 (3x3 stride-1): bn1+relu applied on the fly to y1_raw, one long-K
    # MXU matmul, BN2 partials, and (if downsampling) the fused skip conv.
    outs = _conv3x3_call(y1_raw, mask_p, w2_flat, wp, tile_m=tile_m, halo=halo,
                         affine=(scale1, bias1), skip=skip,
                         y_dtype=jnp.bfloat16, vmem_limit=vmem_limit)
    if downsample:
        y2_raw, s2, q2, ysk_raw, ss, qs = outs
        skip_aff = _bn_affine(ss, qs, gsp, bsp, count)
        ident_arr = ysk_raw
    else:
        y2_raw, s2, q2 = outs
        skip_aff = None
    scale2, bias2 = _bn_affine(s2, q2, g2p, b2p, count)

    # bn2 apply + residual add + relu (elementwise, "parallel" grid).
    out_p = _bn_add_relu_call(y2_raw, ident_arr, scale2, bias2, skip_aff,
                              tile_m=tile_m, vmem_limit=vmem_limit)

    # Channel/lane crop + NCHW transpose kept in XLA.
    # TODO(synk): for a chain of ResBlocks keep the channels-major padded slab
    # between blocks (or fold the crop/transpose into the epilogue grid).
    out = out_p[:cmid, :mp].reshape(cmid, n, hp, wp)[:, :, 1:ho + 1, 1:wo + 1]
    return out.transpose(1, 0, 2, 3)


# --------------------------------------------------------------------------
# Pure-JAX reference (mirrors the PyTorch forward) + param init
# --------------------------------------------------------------------------

def resblock_tier2_reference(x, params):
    def conv(x, w, stride, pad):
        return jax.lax.conv_general_dilated(
            x, w, (stride, stride), [(pad, pad), (pad, pad)],
            dimension_numbers=('NCHW', 'OIHW', 'NCHW'))

    def bn(y, g, b):
        mean = jnp.mean(y, axis=(0, 2, 3), keepdims=True)
        var = jnp.mean(jnp.square(y - mean), axis=(0, 2, 3), keepdims=True)
        return ((y - mean) * jax.lax.rsqrt(var + EPS)
                * g.reshape(1, -1, 1, 1) + b.reshape(1, -1, 1, 1))

    in_c = x.shape[1]
    mid_c = params["w1"].shape[0]
    if mid_c == 2 * in_c:
        ident = bn(conv(x, params["ws"], 2, 0), params["gs"], params["bs"])
        y = jax.nn.relu(bn(conv(x, params["w1"], 2, 1), params["g1"], params["b1"]))
    else:
        ident = x
        y = jax.nn.relu(bn(conv(x, params["w1"], 1, 1), params["g1"], params["b1"]))
    y = bn(conv(y, params["w2"], 1, 1), params["g2"], params["b2"])
    return jax.nn.relu(y + ident)


def init_params(key, in_c, mid_c):
    k1, k2, k3 = jax.random.split(key, 3)
    params = {
        "w1": jax.random.normal(k1, (mid_c, in_c, 3, 3), jnp.float32) * 0.1,
        "g1": jnp.ones((mid_c,), jnp.float32),
        "b1": jnp.zeros((mid_c,), jnp.float32),
        "w2": jax.random.normal(k2, (mid_c, mid_c, 3, 3), jnp.float32) * 0.1,
        "g2": jnp.ones((mid_c,), jnp.float32),
        "b2": jnp.zeros((mid_c,), jnp.float32),
    }
    if mid_c == 2 * in_c:   # downsample skip: 1x1 stride-2 conv + BN
        params["ws"] = jax.random.normal(k3, (mid_c, in_c, 1, 1), jnp.float32) * 0.1
        params["gs"] = jnp.ones((mid_c,), jnp.float32)
        params["bs"] = jnp.zeros((mid_c,), jnp.float32)
    return params


if __name__ == "__main__":
    fwd = jax.jit(resblock_tier2_forward)
    key = jax.random.PRNGKey(0)
    kx1, kp1, kx2, kp2 = jax.random.split(key, 4)

    # Case 1: downsample block (intermediate == 2*in): 4 -> 8, stride-2 + skip conv.
    N, in_c, H, W = 2, 4, 16, 16
    mid_c = 8
    x1 = jax.random.normal(kx1, (N, in_c, H, W), jnp.float32)
    p1 = init_params(kp1, in_c, mid_c)
    out1 = jax.block_until_ready(fwd(x1, p1))
    ref1 = jax.block_until_ready(resblock_tier2_reference(x1, p1))
    np.testing.assert_allclose(np.asarray(out1), np.asarray(ref1),
                               rtol=4e-2, atol=4e-2)

    # Case 2: identity block (in == intermediate): 4 -> 4, stride-1, identity skip.
    x2 = jax.random.normal(kx2, (N, 4, H, W), jnp.float32)
    p2 = init_params(kp2, 4, 4)
    out2 = jax.block_until_ready(fwd(x2, p2))
    ref2 = jax.block_until_ready(resblock_tier2_reference(x2, p2))
    np.testing.assert_allclose(np.asarray(out2), np.asarray(ref2),
                               rtol=4e-2, atol=4e-2)

    print("KERNEL_OK")
</pallas_src>

<mosaic_0001>
module attributes {stable_mosaic.version = 11 : i64} {
  func.func @_matmul_stats_kernel(%arg0: i32, %arg1: memref<144x256xbf16, #tpu.memory_space<vmem>>, %arg2: memref<1x256xf32, #tpu.memory_space<vmem>>, %arg3: memref<16x144xbf16, #tpu.memory_space<vmem>>, %arg4: memref<16x256xbf16, #tpu.memory_space<vmem>>, %arg5: memref<1x16x1xf32, #tpu.memory_space<vmem>>, %arg6: memref<1x16x1xf32, #tpu.memory_space<vmem>>) attributes {dimension_semantics = [#tpu.dimension_semantics<parallel>], iteration_bounds = array<i64: 1>, scalar_prefetch = 0 : i64, scratch_operands = 0 : i64, tpu.core_type = #tpu.core_type<tc>, window_params = [{transform_indices = @transform_0, window_bounds = array<i64: 144, 256>}, {transform_indices = @transform_1, window_bounds = array<i64: 1, 256>}, {pipeline_mode = #tpu.pipeline_mode<synchronous>, transform_indices = @transform_2, window_bounds = array<i64: 16, 144>}, {transform_indices = @transform_3, window_bounds = array<i64: 16, 256>}, {transform_indices = @transform_4, window_bounds = array<i64: 1, 16, 1>}, {transform_indices = @transform_5, window_bounds = array<i64: 1, 16, 1>}]} {
    %c0 = arith.constant 0 : index
    %c0_0 = arith.constant 0 : index
    %0 = vector.load %arg3[%c0, %c0_0] : memref<16x144xbf16, #tpu.memory_space<vmem>>, vector<16x144xbf16>
    %c0_1 = arith.constant 0 : index
    %c0_2 = arith.constant 0 : index
    %1 = vector.load %arg1[%c0_1, %c0_2] : memref<144x256xbf16, #tpu.memory_space<vmem>>, vector<144x256xbf16>
    %cst = arith.constant dense<0.000000e+00> : vector<16x256xf32>
    %2 = tpu.matmul %0, %1, %cst {dimension_numbers = #tpu.dot_dimension_numbers<[1], [0], [0], [1], [0, 0, 1, 1], [], []>} : vector<16x144xbf16>, vector<144x256xbf16>, vector<16x256xf32> -> vector<16x256xf32>
    %3 = arith.truncf %2 : vector<16x256xf32> to vector<16x256xbf16>
    %c0_3 = arith.constant 0 : index
    %c0_4 = arith.constant 0 : index
    %4 = vector.load %arg4[%c0_3, %c0_4] : memref<16x256xbf16, #tpu.memory_space<vmem>>, vector<16x256xbf16>
    tpu.vector_store %arg4[%c0_3, %c0_4], %3 {strides = array<i32>} : memref<16x256xbf16, #tpu.memory_space<vmem>>, vector<16x256xbf16>,
    %c0_5 = arith.constant 0 : index
    %c0_6 = arith.constant 0 : index
    %5 = vector.load %arg2[%c0_5, %c0_6] : memref<1x256xf32, #tpu.memory_space<vmem>>, vector<1x256xf32>
    %6 = vector.broadcast %5 : vector<1x256xf32> to vector<16x256xf32>
    %7 = arith.mulf %2, %6 : vector<16x256xf32>
    %cst_7 = arith.constant dense<0.000000e+00> : vector<16xf32>
    %8 = vector.multi_reduction <add>, %7, %cst_7 [1] : vector<16x256xf32> to vector<16xf32>
    %9 = vector.shape_cast %8 : vector<16xf32> to vector<16x1xf32>
    %c0_8 = arith.constant 0 : index
    %c0_9 = arith.constant 0 : index
    %c0_10 = arith.constant 0 : index
    %10 = vector.load %arg5[%c0_8, %c0_9, %c0_10] : memref<1x16x1xf32, #tpu.memory_space<vmem>>, vector<1x16x1xf32>
    %11 = vector.shape_cast %10 : vector<1x16x1xf32> to vector<16x1xf32>
    %12 = vector.shape_cast %9 : vector<16x1xf32> to vector<1x16x1xf32>
    tpu.vector_store %arg5[%c0_8, %c0_9, %c0_10], %12 {strides = array<i32>} : memref<1x16x1xf32, #tpu.memory_space<vmem>>, vector<1x16x1xf32>,
    %13 = arith.mulf %7, %2 : vector<16x256xf32>
    %cst_11 = arith.constant dense<0.000000e+00> : vector<16xf32>
    %14 = vector.multi_reduction <add>, %13, %cst_11 [1] : vector<16x256xf32> to vector<16xf32>
    %15 = vector.shape_cast %14 : vector<16xf32> to vector<16x1xf32>
    %c0_12 = arith.constant 0 : index
    %c0_13 = arith.constant 0 : index
    %c0_14 = arith.constant 0 : index
    %16 = vector.load %arg6[%c0_12, %c0_13, %c0_14] : memref<1x16x1xf32, #tpu.memory_space<vmem>>, vector<1x16x1xf32>
    %17 = vector.shape_cast %16 : vector<1x16x1xf32> to vector<16x1xf32>
    %18 = vector.shape_cast %15 : vector<16x1xf32> to vector<1x16x1xf32>
    tpu.vector_store %arg6[%c0_12, %c0_13, %c0_14], %18 {strides = array<i32>} : memref<1x16x1xf32, #tpu.memory_space<vmem>>, vector<1x16x1xf32>,
    return
  }
  func.func @transform_0(%arg0: i32) -> (i32, i32) {
    %c0_i32 = arith.constant 0 : i32
    %c0_i32_0 = arith.constant 0 : i32
    return %c0_i32, %arg0 : i32, i32
  }
  func.func @transform_1(%arg0: i32) -> (i32, i32) {
    %c0_i32 = arith.constant 0 : i32
    %c0_i32_0 = arith.constant 0 : i32
    return %c0_i32, %arg0 : i32, i32
  }
  func.func @transform_2(%arg0: i32) -> (i32, i32) {
    %c0_i32 = arith.constant 0 : i32
    %c0_i32_0 = arith.constant 0 : i32
    %c0_i32_1 = arith.constant 0 : i32
    return %c0_i32, %c0_i32_0 : i32, i32
  }
  func.func @transform_3(%arg0: i32) -> (i32, i32) {
    %c0_i32 = arith.constant 0 : i32
    %c0_i32_0 = arith.constant 0 : i32
    return %c0_i32, %arg0 : i32, i32
  }
  func.func @transform_4(%arg0: i32) -> (i32, i32, i32) {
    %c0_i32 = arith.constant 0 : i32
    %c0_i32_0 = arith.constant 0 : i32
    %c0_i32_1 = arith.constant 0 : i32
    return %arg0, %c0_i32, %c0_i32_0 : i32, i32, i32
  }
  func.func @transform_5(%arg0: i32) -> (i32, i32, i32) {
    %c0_i32 = arith.constant 0 : i32
    %c0_i32_0 = arith.constant 0 : i32
    %c0_i32_1 = arith.constant 0 : i32
    return %arg0, %c0_i32, %c0_i32_0 : i32, i32, i32
  }
}

module attributes {stable_mosaic.version = 11 : i64} {
  func.func @_bn_add_relu_kernel(%arg0: i32, %arg1: memref<16x256xbf16, #tpu.memory_space<vmem>>, %arg2: memref<16x256xbf16, #tpu.memory_space<vmem>>, %arg3: memref<16x1xf32, #tpu.memory_space<vmem>>, %arg4: memref<16x1xf32, #tpu.memory_space<vmem>>, %arg5: memref<16x1xf32, #tpu.memory_space<vmem>>, %arg6: memref<16x1xf32, #tpu.memory_space<vmem>>, %arg7: memref<16x256xf32, #tpu.memory_space<vmem>>) attributes {dimension_semantics = [#tpu.dimension_semantics<parallel>], iteration_bounds = array<i64: 1>, scalar_prefetch = 0 : i64, scratch_operands = 0 : i64, tpu.core_type = #tpu.core_type<tc>, window_params = [{transform_indices = @transform_0, window_bounds = array<i64: 16, 256>}, {transform_indices = @transform_1, window_bounds = array<i64: 16, 256>}, {pipeline_mode = #tpu.pipeline_mode<synchronous>, transform_indices = @transform_2, window_bounds = array<i64: 16, 1>}, {pipeline_mode = #tpu.pipeline_mode<synchronous>, transform_indices = @transform_3, window_bounds = array<i64: 16, 1>}, {pipeline_mode = #tpu.pipeline_mode<synchronous>, transform_indices = @transform_4, window_bounds = array<i64: 16, 1>}, {pipeline_mode = #tpu.pipeline_mode<synchronous>, transform_indices = @transform_5, window_bounds = array<i64: 16, 1>}, {transform_indices = @transform_6, window_bounds = array<i64: 16, 256>}]} {
    %c0 = arith.constant 0 : index
    %c0_0 = arith.constant 0 : index
    %0 = vector.load %arg1[%c0, %c0_0] : memref<16x256xbf16, #tpu.memory_space<vmem>>, vector<16x256xbf16>
    %1 = arith.extf %0 : vector<16x256xbf16> to vector<16x256xf32>
    %c0_1 = arith.constant 0 : index
    %c0_2 = arith.constant 0 : index
    %2 = vector.load %arg3[%c0_1, %c0_2] : memref<16x1xf32, #tpu.memory_space<vmem>>, vector<16x1xf32>
    %3 = vector.broadcast %2 : vector<16x1xf32> to vector<16x256xf32>
    %4 = arith.mulf %1, %3 : vector<16x256xf32>
    %c0_3 = arith.constant 0 : index
    %c0_4 = arith.constant 0 : index
    %5 = vector.load %arg4[%c0_3, %c0_4] : memref<16x1xf32, #tpu.memory_space<vmem>>, vector<16x1xf32>
    %6 = vector.broadcast %5 : vector<16x1xf32> to vector<16x256xf32>
    %7 = arith.addf %4, %6 : vector<16x256xf32>
    %c0_5 = arith.constant 0 : index
    %c0_6 = arith.constant 0 : index
    %8 = vector.load %arg2[%c0_5, %c0_6] : memref<16x256xbf16, #tpu.memory_space<vmem>>, vector<16x256xbf16>
    %9 = arith.extf %8 : vector<16x256xbf16> to vector<16x256xf32>
    %c0_7 = arith.constant 0 : index
    %c0_8 = arith.constant 0 : index
    %10 = vector.load %arg5[%c0_7, %c0_8] : memref<16x1xf32, #tpu.memory_space<vmem>>, vector<16x1xf32>
    %11 = vector.broadcast %10 : vector<16x1xf32> to vector<16x256xf32>
    %12 = arith.mulf %9, %11 : vector<16x256xf32>
    %c0_9 = arith.constant 0 : index
    %c0_10 = arith.constant 0 : index
    %13 = vector.load %arg6[%c0_9, %c0_10] : memref<16x1xf32, #tpu.memory_space<vmem>>, vector<16x1xf32>
    %14 = vector.broadcast %13 : vector<16x1xf32> to vector<16x256xf32>
    %15 = arith.addf %12, %14 : vector<16x256xf32>
    %16 = arith.addf %7, %15 : vector<16x256xf32>
    %cst = arith.constant 0.000000e+00 : f32
    %17 = vector.broadcast %cst : f32 to vector<16x256xf32>
    %18 = arith.maximumf %16, %17 : vector<16x256xf32>
    %c0_11 = arith.constant 0 : index
    %c0_12 = arith.constant 0 : index
    %19 = vector.load %arg7[%c0_11, %c0_12] : memref<16x256xf32, #tpu.memory_space<vmem>>, vector<16x256xf32>
    tpu.vector_store %arg7[%c0_11, %c0_12], %18 {strides = array<i32>} : memref<16x256xf32, #tpu.memory_space<vmem>>, vector<16x256xf32>,
    return
  }
  func.func @transform_0(%arg0: i32) -> (i32, i32) {
    %c0_i32 = arith.constant 0 : i32
    %c0_i32_0 = arith.constant 0 : i32
    return %c0_i32, %arg0 : i32, i32
  }
  func.func @transform_1(%arg0: i32) -> (i32, i32) {
    %c0_i32 = arith.constant 0 : i32
    %c0_i32_0 = arith.constant 0 : i32
    return %c0_i32, %arg0 : i32, i32
  }
  func.func @transform_2(%arg0: i32) -> (i32, i32) {
    %c0_i32 = arith.constant 0 : i32
    %c0_i32_0 = arith.constant 0 : i32
    %c0_i32_1 = arith.constant 0 : i32
    return %c0_i32, %c0_i32_0 : i32, i32
  }
  func.func @transform_3(%arg0: i32) -> (i32, i32) {
    %c0_i32 = arith.constant 0 : i32
    %c0_i32_0 = arith.constant 0 : i32
    %c0_i32_1 = arith.constant 0 : i32
    return %c0_i32, %c0_i32_0 : i32, i32
  }
  func.func @transform_4(%arg0: i32) -> (i32, i32) {
    %c0_i32 = arith.constant 0 : i32
    %c0_i32_0 = arith.constant 0 : i32
    %c0_i32_1 = arith.constant 0 : i32
    return %c0_i32, %c0_i32_0 : i32, i32
  }
  func.func @transform_5(%arg0: i32) -> (i32, i32) {
    %c0_i32 = arith.constant 0 : i32
    %c0_i32_0 = arith.constant 0 : i32
    %c0_i32_1 = arith.constant 0 : i32
    return %c0_i32, %c0_i32_0 : i32, i32
  }
  func.func @transform_6(%arg0: i32) -> (i32, i32) {
    %c0_i32 = arith.constant 0 : i32
    %c0_i32_0 = arith.constant 0 : i32
    return %c0_i32, %arg0 : i32, i32
  }
}

module attributes {stable_mosaic.version = 11 : i64} {
  func.func @_conv_taps_kernel(%arg0: i32, %arg1: memref<16x128xbf16, #tpu.memory_space<vmem>>, %arg2: memref<16x256xbf16, #tpu.memory_space<vmem>>, %arg3: memref<16x128xbf16, #tpu.memory_space<vmem>>, %arg4: memref<1x128xf32, #tpu.memory_space<vmem>>, %arg5: memref<1x256xf32, #tpu.memory_space<vmem>>, %arg6: memref<1x128xf32, #tpu.memory_space<vmem>>, %arg7: memref<16x144xbf16, #tpu.memory_space<vmem>>, %arg8: memref<16x1xf32, #tpu.memory_space<vmem>>, %arg9: memref<16x1xf32, #tpu.memory_space<vmem>>, %arg10: memref<16x256xbf16, #tpu.memory_space<vmem>>, %arg11: memref<16x16xbf16, #tpu.memory_space<vmem>>, %arg12: memref<16x256xbf16, #tpu.memory_space<vmem>>, %arg13: memref<1x16x1xf32, #tpu.memory_space<vmem>>, %arg14: memref<1x16x1xf32, #tpu.memory_space<vmem>>, %arg15: memref<16x256xbf16, #tpu.memory_space<vmem>>, %arg16: memref<1x16x1xf32, #tpu.memory_space<vmem>>, %arg17: memref<1x16x1xf32, #tpu.memory_space<vmem>>) attributes {dimension_semantics = [#tpu.dimension_semantics<parallel>], iteration_bounds = array<i64: 1>, scalar_prefetch = 0 : i64, scratch_operands = 0 : i64, tpu.core_type = #tpu.core_type<tc>, window_params = [{transform_indices = @transform_0, window_bounds = array<i64: 16, 128>}, {transform_indices = @transform_1, window_bounds = array<i64: 16, 256>}, {transform_indices = @transform_2, window_bounds = array<i64: 16, 128>}, {transform_indices = @transform_3, window_bounds = array<i64: 1, 128>}, {transform_indices = @transform_4, window_bounds = array<i64: 1, 256>}, {transform_indices = @transform_5, window_bounds = array<i64: 1, 128>}, {pipeline_mode = #tpu.pipeline_mode<synchronous>, transform_indices = @transform_6, window_bounds = array<i64: 16, 144>}, {pipeline_mode = #tpu.pipeline_mode<synchronous>, transform_indices = @transform_7, window_bounds = array<i64: 16, 1>}, {pipeline_mode = #tpu.pipeline_mode<synchronous>, transform_indices = @transform_8, window_bounds = array<i64: 16, 1>}, {transform_indices = @transform_9, window_bounds = array<i64: 16, 256>}, {pipeline_mode = #tpu.pipeline_mode<synchronous>, transform_indices = @transform_10, window_bounds = array<i64: 16, 16>}, {transform_indices = @transform_11, window_bounds = array<i64: 16, 256>}, {transform_indices = @transform_12, window_bounds = array<i64: 1, 16, 1>}, {transform_indices = @transform_13, window_bounds = array<i64: 1, 16, 1>}, {transform_indices = @transform_14, window_bounds = array<i64: 16, 256>}, {transform_indices = @transform_15, window_bounds = array<i64: 1, 16, 1>}, {transform_indices = @transform_16, window_bounds = array<i64: 1, 16, 1>}]} {
    %c0 = arith.constant 0 : index
    %c0_0 = arith.constant 0 : index
    %0 = vector.load %arg5[%c0, %c0_0] : memref<1x256xf32, #tpu.memory_space<vmem>>, vector<1x256xf32>
    %c0_1 = arith.constant 0 : index
    %c0_2 = arith.constant 0 : index
    %1 = vector.load %arg1[%c0_1, %c0_2] : memref<16x128xbf16, #tpu.memory_space<vmem>>, vector<16x128xbf16>
    %c0_3 = arith.constant 0 : index
    %c0_4 = arith.constant 0 : index
    %2 = vector.load %arg2[%c0_3, %c0_4] : memref<16x256xbf16, #tpu.memory_space<vmem>>, vector<16x256xbf16>
    %c0_5 = arith.constant 0 : index
    %c0_6 = arith.constant 0 : index
    %3 = vector.load %arg3[%c0_5, %c0_6] : memref<16x128xbf16, #tpu.memory_space<vmem>>, vector<16x128xbf16>
    %4 = tpu.concatenate %1, %2, %3 in 1 : vector<16x128xbf16>, vector<16x256xbf16>, vector<16x128xbf16> -> vector<16x512xbf16>
    %c0_7 = arith.constant 0 : index
    %c0_8 = arith.constant 0 : index
    %5 = vector.load %arg4[%c0_7, %c0_8] : memref<1x128xf32, #tpu.memory_space<vmem>>, vector<1x128xf32>
    %c0_9 = arith.constant 0 : index
    %c0_10 = arith.constant 0 : index
    %6 = vector.load %arg6[%c0_9, %c0_10] : memref<1x128xf32, #tpu.memory_space<vmem>>, vector<1x128xf32>
    %7 = tpu.concatenate %5, %0, %6 in 1 : vector<1x128xf32>, vector<1x256xf32>, vector<1x128xf32> -> vector<1x512xf32>
    %8 = arith.extf %4 : vector<16x512xbf16> to vector<16x512xf32>
    %c0_11 = arith.constant 0 : index
    %c0_12 = arith.constant 0 : index
    %9 = vector.load %arg8[%c0_11, %c0_12] : memref<16x1xf32, #tpu.memory_space<vmem>>, vector<16x1xf32>
    %10 = vector.broadcast %9 : vector<16x1xf32> to vector<16x512xf32>
    %11 = arith.mulf %8, %10 : vector<16x512xf32>
    %c0_13 = arith.constant 0 : index
    %c0_14 = arith.constant 0 : index
    %12 = vector.load %arg9[%c0_13, %c0_14] : memref<16x1xf32, #tpu.memory_space<vmem>>, vector<16x1xf32>
    %13 = vector.broadcast %12 : vector<16x1xf32> to vector<16x512xf32>
    %14 = arith.addf %11, %13 : vector<16x512xf32>
    %cst = arith.constant 0.000000e+00 : f32
    %15 = vector.broadcast %cst : f32 to vector<16x512xf32>
    %16 = arith.maximumf %14, %15 : vector<16x512xf32>
    %17 = vector.broadcast %7 : vector<1x512xf32> to vector<16x512xf32>
    %18 = arith.mulf %16, %17 : vector<16x512xf32>
    %19 = arith.truncf %18 : vector<16x512xf32> to vector<16x512xbf16>
    %20 = vector.extract_strided_slice %19 {offsets = [0, 117], sizes = [16, 256], strides = [1, 1]} : vector<16x512xbf16> to vector<16x256xbf16>
    %21 = vector.extract_strided_slice %19 {offsets = [0, 118], sizes = [16, 256], strides = [1, 1]} : vector<16x512xbf16> to vector<16x256xbf16>
    %22 = vector.extract_strided_slice %19 {offsets = [0, 119], sizes = [16, 256], strides = [1, 1]} : vector<16x512xbf16> to vector<16x256xbf16>
    %23 = vector.extract_strided_slice %19 {offsets = [0, 127], sizes = [16, 256], strides = [1, 1]} : vector<16x512xbf16> to vector<16x256xbf16>
    %24 = vector.extract_strided_slice %19 {offsets = [0, 128], sizes = [16, 256], strides = [1, 1]} : vector<16x512xbf16> to vector<16x256xbf16>
    %25 = vector.extract_strided_slice %19 {offsets = [0, 129], sizes = [16, 256], strides = [1, 1]} : vector<16x512xbf16> to vector<16x256xbf16>
    %26 = vector.extract_strided_slice %19 {offsets = [0, 137], sizes = [16, 256], strides = [1, 1]} : vector<16x512xbf16> to vector<16x256xbf16>
    %27 = vector.extract_strided_slice %19 {offsets = [0, 138], sizes = [16, 256], strides = [1, 1]} : vector<16x512xbf16> to vector<16x256xbf16>
    %28 = vector.extract_strided_slice %19 {offsets = [0, 139], sizes = [16, 256], strides = [1, 1]} : vector<16x512xbf16> to vector<16x256xbf16>
    %29 = tpu.concatenate %20, %21, %22, %23, %24, %25, %26, %27, %28 in 0 : vector<16x256xbf16>, vector<16x256xbf16>, vector<16x256xbf16>, vector<16x256xbf16>, vector<16x256xbf16>, vector<16x256xbf16>, vector<16x256xbf16>, vector<16x256xbf16>, vector<16x256xbf16> -> vector<144x256xbf16>
    %c0_15 = arith.constant 0 : index
    %c0_16 = arith.constant 0 : index
    %30 = vector.load %arg7[%c0_15, %c0_16] : memref<16x144xbf16, #tpu.memory_space<vmem>>, vector<16x144xbf16>
    %cst_17 = arith.constant dense<0.000000e+00> : vector<16x256xf32>
    %31 = tpu.matmul %30, %29, %cst_17 {dimension_numbers = #tpu.dot_dimension_numbers<[1], [0], [0], [1], [0, 0, 1, 1], [], []>} : vector<16x144xbf16>, vector<144x256xbf16>, vector<16x256xf32> -> vector<16x256xf32>
    %32 = arith.truncf %31 : vector<16x256xf32> to vector<16x256xbf16>
    %c0_18 = arith.constant 0 : index
    %c0_19 = arith.constant 0 : index
    %33 = vector.load %arg12[%c0_18, %c0_19] : memref<16x256xbf16, #tpu.memory_space<vmem>>, vector<16x256xbf16>
    tpu.vector_store %arg12[%c0_18, %c0_19], %32 {strides = array<i32>} : memref<16x256xbf16, #tpu.memory_space<vmem>>, vector<16x256xbf16>,
    %34 = vector.broadcast %0 : vector<1x256xf32> to vector<16x256xf32>
    %35 = arith.mulf %31, %34 : vector<16x256xf32>
    %cst_20 = arith.constant dense<0.000000e+00> : vector<16xf32>
    %36 = vector.multi_reduction <add>, %35, %cst_20 [1] : vector<16x256xf32> to vector<16xf32>
    %37 = vector.shape_cast %36 : vector<16xf32> to vector<16x1xf32>
    %c0_21 = arith.constant 0 : index
    %c0_22 = arith.constant 0 : index
    %c0_23 = arith.constant 0 : index
    %38 = vector.load %arg13[%c0_21, %c0_22, %c0_23] : memref<1x16x1xf32, #tpu.memory_space<vmem>>, vector<1x16x1xf32>
    %39 = vector.shape_cast %38 : vector<1x16x1xf32> to vector<16x1xf32>
    %40 = vector.shape_cast %37 : vector<16x1xf32> to vector<1x16x1xf32>
    tpu.vector_store %arg13[%c0_21, %c0_22, %c0_23], %40 {strides = array<i32>} : memref<1x16x1xf32, #tpu.memory_space<vmem>>, vector<1x16x1xf32>,
    %41 = arith.mulf %35, %31 : vector<16x256xf32>
    %cst_24 = arith.constant dense<0.000000e+00> : vector<16xf32>
    %42 = vector.multi_reduction <add>, %41, %cst_24 [1] : vector<16x256xf32> to vector<16xf32>
    %43 = vector.shape_cast %42 : vector<16xf32> to vector<16x1xf32>
    %c0_25 = arith.constant 0 : index
    %c0_26 = arith.constant 0 : index
    %c0_27 = arith.constant 0 : index
    %44 = vector.load %arg14[%c0_25, %c0_26, %c0_27] : memref<1x16x1xf32, #tpu.memory_space<vmem>>, vector<1x16x1xf32>
    %45 = vector.shape_cast %44 : vector<1x16x1xf32> to vector<16x1xf32>
    %46 = vector.shape_cast %43 : vector<16x1xf32> to vector<1x16x1xf32>
    tpu.vector_store %arg14[%c0_25, %c0_26, %c0_27], %46 {strides = array<i32>} : memref<1x16x1xf32, #tpu.memory_space<vmem>>, vector<1x16x1xf32>,
    %c0_28 = arith.constant 0 : index
    %c0_29 = arith.constant 0 : index
    %47 = vector.load %arg11[%c0_28, %c0_29] : memref<16x16xbf16, #tpu.memory_space<vmem>>, vector<16x16xbf16>
    %c0_30 = arith.constant 0 : index
    %c0_31 = arith.constant 0 : index
    %48 = vector.load %arg10[%c0_30, %c0_31] : memref<16x256xbf16, #tpu.memory_space<vmem>>, vector<16x256xbf16>
    %cst_32 = arith.constant dense<0.000000e+00> : vector<16x256xf32>
    %49 = tpu.matmul %47, %48, %cst_32 {dimension_numbers = #tpu.dot_dimension_numbers<[1], [0], [0], [1], [0, 0, 1, 1], [], []>} : vector<16x16xbf16>, vector<16x256xbf16>, vector<16x256xf32> -> vector<16x256xf32>
    %50 = arith.truncf %49 : vector<16x256xf32> to vector<16x256xbf16>
    %c0_33 = arith.constant 0 : index
    %c0_34 = arith.constant 0 : index
    %51 = vector.load %arg15[%c0_33, %c0_34] : memref<16x256xbf16, #tpu.memory_space<vmem>>, vector<16x256xbf16>
    tpu.vector_store %arg15[%c0_33, %c0_34], %50 {strides = array<i32>} : memref<16x256xbf16, #tpu.memory_space<vmem>>, vector<16x256xbf16>,
    %52 = vector.broadcast %0 : vector<1x256xf32> to vector<16x256xf32>
    %53 = arith.mulf %49, %52 : vector<16x256xf32>
    %cst_35 = arith.constant dense<0.000000e+00> : vector<16xf32>
    %54 = vector.multi_reduction <add>, %53, %cst_35 [1] : vector<16x256xf32> to vector<16xf32>
    %55 = vector.shape_cast %54 : vector<16xf32> to vector<16x1xf32>
    %c0_36 = arith.constant 0 : index
    %c0_37 = arith.constant 0 : index
    %c0_38 = arith.constant 0 : index
    %56 = vector.load %arg16[%c0_36, %c0_37, %c0_38] : memref<1x16x1xf32, #tpu.memory_space<vmem>>, vector<1x16x1xf32>
    %57 = vector.shape_cast %56 : vector<1x16x1xf32> to vector<16x1xf32>
    %58 = vector.shape_cast %55 : vector<16x1xf32> to vector<1x16x1xf32>
    tpu.vector_store %arg16[%c0_36, %c0_37, %c0_38], %58 {strides = array<i32>} : memref<1x16x1xf32, #tpu.memory_space<vmem>>, vector<1x16x1xf32>,
    %59 = arith.mulf %53, %49 : vector<16x256xf32>
    %cst_39 = arith.constant dense<0.000000e+00> : vector<16xf32>
    %60 = vector.multi_reduction <add>, %59, %cst_39 [1] : vector<16x256xf32> to vector<16xf32>
    %61 = vector.shape_cast %60 : vector<16xf32> to vector<16x1xf32>
    %c0_40 = arith.constant 0 : index
    %c0_41 = arith.constant 0 : index
    %c0_42 = arith.constant 0 : index
    %62 = vector.load %arg17[%c0_40, %c0_41, %c0_42] : memref<1x16x1xf32, #tpu.memory_space<vmem>>, vector<1x16x1xf32>
    %63 = vector.shape_cast %62 : vector<1x16x1xf32> to vector<16x1xf32>
    %64 = vector.shape_cast %61 : vector<16x1xf32> to vector<1x16x1xf32>
    tpu.vector_store %arg17[%c0_40, %c0_41, %c0_42], %64 {strides = array<i32>} : memref<1x16x1xf32, #tpu.memory_space<vmem>>, vector<1x16x1xf32>,
    return
  }
  func.func @transform_0(%arg0: i32) -> (i32, i32) {
    %c2_i32 = arith.constant 2 : i32
    %0 = arith.muli %arg0, %c2_i32 : i32
    %c1_i32 = arith.constant 1 : i32
    %1 = arith.subi %0, %c1_i32 : i32
    %c0_i32 = arith.constant 0 : i32
    %2 = arith.maxsi %1, %c0_i32 : i32
    %c0_i32_0 = arith.constant 0 : i32
    %c0_i32_1 = arith.constant 0 : i32
    return %c0_i32_0, %2 : i32, i32
  }
  func.func @transform_1(%arg0: i32) -> (i32, i32) {
    %c0_i32 = arith.constant 0 : i32
    %c0_i32_0 = arith.constant 0 : i32
    return %c0_i32, %arg0 : i32, i32
  }
  func.func @transform_2(%arg0: i32) -> (i32, i32) {
    %c1_i32 = arith.constant 1 : i32
    %0 = arith.addi %arg0, %c1_i32 : i32
    %c2_i32 = arith.constant 2 : i32
    %1 = arith.muli %0, %c2_i32 : i32
    %c1_i32_0 = arith.constant 1 : i32
    %2 = arith.minsi %1, %c1_i32_0 : i32
    %c0_i32 = arith.constant 0 : i32
    %c0_i32_1 = arith.constant 0 : i32
    return %c0_i32, %2 : i32, i32
  }
  func.func @transform_3(%arg0: i32) -> (i32, i32) {
    %c2_i32 = arith.constant 2 : i32
    %0 = arith.muli %arg0, %c2_i32 : i32
    %c1_i32 = arith.constant 1 : i32
    %1 = arith.subi %0, %c1_i32 : i32
    %c0_i32 = arith.constant 0 : i32
    %2 = arith.maxsi %1, %c0_i32 : i32
    %c0_i32_0 = arith.constant 0 : i32
    %c0_i32_1 = arith.constant 0 : i32
    return %c0_i32_0, %2 : i32, i32
  }
  func.func @transform_4(%arg0: i32) -> (i32, i32) {
    %c0_i32 = arith.constant 0 : i32
    %c0_i32_0 = arith.constant 0 : i32
    return %c0_i32, %arg0 : i32, i32
  }
  func.func @transform_5(%arg0: i32) -> (i32, i32) {
    %c1_i32 = arith.constant 1 : i32
    %0 = arith.addi %arg0, %c1_i32 : i32
    %c2_i32 = arith.constant 2 : i32
    %1 = arith.muli %0, %c2_i32 : i32
    %c1_i32_0 = arith.constant 1 : i32
    %2 = arith.minsi %1, %c1_i32_0 : i32
    %c0_i32 = arith.constant 0 : i32
    %c0_i32_1 = arith.constant 0 : i32
    return %c0_i32, %2 : i32, i32
  }
  func.func @transform_6(%arg0: i32) -> (i32, i32) {
    %c0_i32 = arith.constant 0 : i32
    %c0_i32_0 = arith.constant 0 : i32
    %c0_i32_1 = arith.constant 0 : i32
    return %c0_i32, %c0_i32_0 : i32, i32
  }
  func.func @transform_7(%arg0: i32) -> (i32, i32) {
    %c0_i32 = arith.constant 0 : i32
    %c0_i32_0 = arith.constant 0 : i32
    %c0_i32_1 = arith.constant 0 : i32
    return %c0_i32, %c0_i32_0 : i32, i32
  }
  func.func @transform_8(%arg0: i32) -> (i32, i32) {
    %c0_i32 = arith.constant 0 : i32
    %c0_i32_0 = arith.constant 0 : i32
    %c0_i32_1 = arith.constant 0 : i32
    return %c0_i32, %c0_i32_0 : i32, i32
  }
  func.func @transform_9(%arg0: i32) -> (i32, i32) {
    %c0_i32 = arith.constant 0 : i32
    %c0_i32_0 = arith.constant 0 : i32
    return %c0_i32, %arg0 : i32, i32
  }
  func.func @transform_10(%arg0: i32) -> (i32, i32) {
    %c0_i32 = arith.constant 0 : i32
    %c0_i32_0 = arith.constant 0 : i32
    %c0_i32_1 = arith.constant 0 : i32
    return %c0_i32, %c0_i32_0 : i32, i32
  }
  func.func @transform_11(%arg0: i32) -> (i32, i32) {
    %c0_i32 = arith.constant 0 : i32
    %c0_i32_0 = arith.constant 0 : i32
    return %c0_i32, %arg0 : i32, i32
  }
  func.func @transform_12(%arg0: i32) -> (i32, i32, i32) {
    %c0_i32 = arith.constant 0 : i32
    %c0_i32_0 = arith.constant 0 : i32
    %c0_i32_1 = arith.constant 0 : i32
    return %arg0, %c0_i32, %c0_i32_0 : i32, i32, i32
  }
  func.func @transform_13(%arg0: i32) -> (i32, i32, i32) {
    %c0_i32 = arith.constant 0 : i32
    %c0_i32_0 = arith.constant 0 : i32
    %c0_i32_1 = arith.constant 0 : i32
    return %arg0, %c0_i32, %c0_i32_0 : i32, i32, i32
  }
  func.func @transform_14(%arg0: i32) -> (i32, i32) {
    %c0_i32 = arith.constant 0 : i32
    %c0_i32_0 = arith.constant 0 : i32
    return %c0_i32, %arg0 : i32, i32
  }
  func.func @transform_15(%arg0: i32) -> (i32, i32, i32) {
    %c0_i32 = arith.constant 0 : i32
    %c0_i32_0 = arith.constant 0 : i32
    %c0_i32_1 = arith.constant 0 : i32
    return %arg0, %c0_i32, %c0_i32_0 : i32, i32, i32
  }
  func.func @transform_16(%arg0: i32) -> (i32, i32, i32) {
    %c0_i32 = arith.constant 0 : i32
    %c0_i32_0 = arith.constant 0 : i32
    %c0_i32_1 = arith.constant 0 : i32
    return %arg0, %c0_i32, %c0_i32_0 : i32, i32, i32
  }
}

</mosaic_0001>

<bundles_post_ra>
// kernel: tile.6
= control target key start
LH: loop header
LB: loop body
LE: loop exit
PB: predicated region body
PF: predicated region fallthrough
CT: control target
= control target key end

     0   :  { %s22_s0 = inlined_call_operand.vmem [shape: f32[100], index: 0, kind: input, shape index: {}]   ;;  %s23_s1 = inlined_call_operand.vmem [shape: f32[2,100], index: 1, kind: output, shape index: {}]  }
   0x1   :  { %v4_v0 = vld [vmem:[%s22_s0] ss:$0 sm:$0xff] }
   0x2   :  { %5 = vst [vmem:[%s23_s1] sm:$0x3] %v4_v0 }

// kernel: tile.7
= control target key start
LH: loop header
LB: loop body
LE: loop exit
PB: predicated region body
PF: predicated region fallthrough
CT: control target
= control target key end

     0   :  { %vm13_vm0 = vcmask 228352   ;;  %vm7_vm1 = vcmask 818176   ;;  %vm17_vm2 = vcmask 588800   ;;  %vm20_vm3 = vcmask 1048352   ;;  %s55_s0 = inlined_call_operand.vmem [shape: f32[2,100], index: 0, kind: input, shape index: {}]   ;;  %s56_s1 = inlined_call_operand.vmem [shape: f32[1,200], index: 1, kind: output, shape index: {}]  }
   0x1   :  { %v4_v0 = vld [vmem:[%s55_s0] sm:$0x3]  ;;  %s35_s0 = smov 100  }
   0x2   :  { %5 = vst [vmem:[#allocation1] sm:$0x3] %v4_v0 }
   0x9   :  { %v10_v1 = vld [vmem:[#allocation1 + $0x1] sm:$0x1]   ;;  %v6_v3 = vld [vmem:[#allocation1] sm:$0x1]  }
   0xa   :  { %v12_v2 = vld [vmem:[#allocation1 + $0x1] sm:$0x1]   ;;  %8 = vst.msk [vmem:[#allocation0] sm:$0x1] %vm7_vm1, %v6_v3  }
   0xb   :  { %v14_v4 = vsel %vm13_vm0, %v12_v2, %v10_v1 }
   0xc   :  { %15 = vrot.lane.b32.xlu0 %v14_v4, %s35_s0 }
  0x7e   :  { %v16_v5 = vpop.permute.xlu0 %15  }
  0x7f   :  { %19 = vst.msk [vmem:[#allocation0 + $0x8] sm:$0x1] %vm17_vm2, %v16_v5  }
  0x80   :  { %21 = vst.msk [vmem:[#allocation0] sm:$0x1] %vm20_vm3, %v16_v5  }
  0x86   :  { %v29_v7 = vld [vmem:[#allocation0 + $0x8] sm:$0x1] }
  0x87   :  { %v25_v6 = vld [vmem:[#allocation0] sm:$0x1]  ;;  %33 = vst [vmem:[%s56_s1 + $0x1] sm:$0x1] %v29_v7 }
  0x88   :  { %27 = vst [vmem:[%s56_s1] sm:$0x1] %v25_v6 }

// kernel: resblock_tier2_forward.3
= control target key start
LH: loop header
LB: loop body
LE: loop exit
PB: predicated region body
PF: predicated region fallthrough
CT: control target
= control target key end

     0   :  { %vm137_vm0 = vcmask 130048   ;;  %v200_v20 = vlaneseq  ;;  %vm220_vm1 = vcmask 7168   ;;  %s413_s0 = inlined_call_operand.vmem [shape: bf16[144,256], index: 0, kind: input, shape index: {}]   ;;  %s414_s2 = inlined_call_operand.vmem [shape: bf16[16,144], index: 2, kind: input, shape index: {}]   ;;  %s415_s1 = inlined_call_operand.vmem [shape: f32[1,256], index: 1, kind: input, shape index: {}]   ;;  %s416_s3 = inlined_call_operand.vmem [shape: bf16[16,256], index: 3, kind: output, shape index: {0}]   ;;  %s417_s4 = inlined_call_operand.vmem [shape: f32[1,16,1], index: 4, kind: output, shape index: {1}]   ;;  %s418_s5 = inlined_call_operand.vmem [shape: f32[1,16,1], index: 5, kind: output, shape index: {2}]  }
   0x1   :  { %v272_v0 = vld [vmem:[%s413_s0 + $0x4] ss:$8 sps:$4 sm:$0xff]   ;;  %v274_v1 = vld [vmem:[%s413_s0] ss:$8 sps:$4 sm:$0xff]   ;;  %v275_v2 = vld [vmem:[%s413_s0 + $0x14] ss:$8 sps:$4 sm:$0xff]  }
   0x2   :  { %141 = vmatprep.subr.bf16.mxu0 %v272_v0  ;;  %v277_v3 = vld [vmem:[%s413_s0 + $0x10] ss:$8 sps:$4 sm:$0xff]   ;;  %v278_v4 = vld [vmem:[%s413_s0 + $0x24] ss:$8 sps:$4 sm:$0xff]   ;;  %v280_v5 = vld [vmem:[%s413_s0 + $0x20] ss:$8 sps:$4 sm:$0xff]  }
   0x3   :  { %142 = vmatpush1.bf16.msra.mxu0 %v274_v1  ;;  %v281_v6 = vld [vmem:[%s413_s0 + $0x34] ss:$8 sps:$4 sm:$0xff]   ;;  %v283_v7 = vld [vmem:[%s413_s0 + $0x30] ss:$8 sps:$4 sm:$0xff]   ;;  %v284_v8 = vld [vmem:[%s413_s0 + $0x44] ss:$8 sps:$4 sm:$0xff]  }
   0x4   :  { %143 = vmatprep.subr.bf16.mxu0 %v275_v2  ;;  %v301_v9 = vld [vmem:[%s414_s2 + $0x4] ss:$8 sps:$4 sm:$0xff]   ;;  %v286_v10 = vld [vmem:[%s413_s0 + $0x40] ss:$8 sps:$4 sm:$0xff]   ;;  %v287_v11 = vld [vmem:[%s413_s0 + $0x54] ss:$8 sps:$4 sm:$0xff]  }
   0x5   :  { %267 = vmatprep.mubr.msk.bf16.mxu0 %vm137_vm0, %v301_v9  ;;  %v289_v12 = vld [vmem:[%s413_s0 + $0x50] ss:$8 sps:$4 sm:$0xff]   ;;  %v290_v13 = vld [vmem:[%s413_s0 + $0x64] ss:$8 sps:$4 sm:$0xff]   ;;  %v292_v14 = vld [vmem:[%s413_s0 + $0x60] ss:$8 sps:$4 sm:$0xff]  }
   0x6   :  { %v293_v15 = vld [vmem:[%s413_s0 + $0x74] ss:$8 sps:$4 sm:$0xff]   ;;  %v295_v16 = vld [vmem:[%s413_s0 + $0x70] ss:$8 sps:$4 sm:$0xff]   ;;  %v296_v17 = vld [vmem:[%s413_s0 + $0x84] ss:$8 sps:$4 sm:$0xff]  }
   0x7   :  { %144 = vmatpush1.bf16.msra.mxu0 %v277_v3  ;;  %v298_v18 = vld [vmem:[%s413_s0 + $0x80] ss:$8 sps:$4 sm:$0xff]   ;;  %v201_v21 = vshrl.u32 %v200_v20, 7 }
   0x8   :  { %145 = vmatprep.subr.bf16.mxu0 %v278_v4  ;;  %v299_v19 = vld [vmem:[%s414_s2] ss:$8 sps:$4 sm:$0xff]  }
   0x9   :  { %v202_v22 = vsub.s32 0, %v201_v21  ;;  %v198_v23 = vld [vmem:[%s415_s1] sm:$0x3]  ;;  %v206_v24 = vsub.s32 1, %v201_v21 }
   0xb   :  { %146 = vmatpush1.bf16.msra.mxu0 %v280_v5  ;;  %v203_v25 = vrot.slane %v198_v23, %v202_v22  ;;  %v207_v26 = vrot.slane %v198_v23, %v206_v24 }
   0xc   :  { %147 = vmatprep.subr.bf16.mxu0 %v281_v6 }
   0xf   :  { %148 = vmatpush1.bf16.msra.mxu0 %v283_v7 }
  0x10   :  { %149 = vmatprep.subr.bf16.mxu0 %v284_v8 }
  0x13   :  { %150 = vmatpush1.bf16.msra.mxu0 %v286_v10 }
  0x14   :  { %151 = vmatprep.subr.bf16.mxu0 %v287_v11 }
  0x17   :  { %152 = vmatpush1.bf16.msra.mxu0 %v289_v12 }
  0x18   :  { %153 = vmatprep.subr.bf16.mxu0 %v290_v13 }
  0x1b   :  { %154 = vmatpush1.bf16.msra.mxu0 %v292_v14 }
  0x1c   :  { %155 = vmatprep.subr.bf16.mxu0 %v293_v15 }
  0x1f   :  { %156 = vmatpush1.bf16.msra.mxu0 %v295_v16 }
  0x20   :  { %157 = vmatprep.subr.bf16.mxu0 %v296_v17 }
  0x23   :  { %158 = vmatpush1.bf16.msra.mxu0 %v298_v18 }
  0x26   :  { %174 = vmatmul.mubr.bf16.vlgmr.msra.gmra.mrb[0].mxu0 %v299_v19 }
  0xf9   :  { %v175_v27 = vpop.f32.mrb[0].mxu0 }
  0xfa   :  { %v177_v28 = vpop.f32.mrb[1].mxu0  ;;  %v210_v29 = vmul.f32 %v203_v25, %v175_v27 }
  0xfb   :  { %v270_v30 = vpack.c.bf16 %v177_v28, %v175_v27  ;;  %v179_v31 = vpop.f32.mrb[2].mxu0  ;;  %v211_v32 = vmul.f32 %v207_v26, %v177_v28 }
  0xfc   :  { %v181_v33 = vpop.f32.mrb[3].mxu0  ;;  %v223_v34 = vmul.f32 %v210_v29, %v175_v27  ;;  %v212_v35 = vmul.f32 %v203_v25, %v179_v31 }
  0xfd   :  { %v271_v36 = vpack.c.bf16 %v181_v33, %v179_v31  ;;  %196 = vst [vmem:[%s416_s3] sm:$0xff] %v270_v30  ;;  %v213_v37 = vmul.f32 %v207_v26, %v181_v33  ;;  %v214_v38 = vadd.f32 %v211_v32, %v210_v29  ;;  %v224_v39 = vmul.f32 %v211_v32, %v177_v28 }
  0xfe   :  { %v225_v40 = vmul.f32 %v212_v35, %v179_v31 }
  0xff   :  { %197 = vst [vmem:[%s416_s3 + $0x8] sm:$0xff] %v271_v36  ;;  %v226_v41 = vmul.f32 %v213_v37, %v181_v33  ;;  %215 = vadd.xlane.f32.xlu0 %v214_v38  ;;  %v227_v42 = vadd.f32 %v224_v39, %v223_v34  ;;  %v217_v43 = vadd.f32 %v213_v37, %v212_v35 }
 0x101   :  { %228 = vadd.xlane.f32.xlu1 %v227_v42  ;;  %v230_v44 = vadd.f32 %v226_v41, %v225_v40 }
 0x103   :  { %218 = vadd.xlane.f32.xlu0 %v217_v43 }
 0x105   :  { %231 = vadd.xlane.f32.xlu1 %v230_v44 }
 0x18c   :  { %v216_v45 = vpop.xlane.xlu0 %215 }
 0x18d   :  { %221 = vst.msk [vmem:[%s417_s4] sm:$0xff] %vm220_vm1, %v216_v45 }
 0x18e   :  { %v229_v46 = vpop.xlane.xlu1 %228 }
 0x18f   :  { %233 = vst.msk [vmem:[%s418_s5] sm:$0xff] %vm220_vm1, %v229_v46 }
 0x190   :  { %v219_v47 = vpop.xlane.xlu0 %218 }
 0x191   :  { %222 = vst.msk [vmem:[%s417_s4 + $0x8] sm:$0xff] %vm220_vm1, %v219_v47 }
 0x192   :  { %v232_v48 = vpop.xlane.xlu1 %231 }
 0x193   :  { %234 = vst.msk [vmem:[%s418_s5 + $0x8] sm:$0xff] %vm220_vm1, %v232_v48 }

// kernel: resblock_tier2_forward.5
= control target key start
LH: loop header
LB: loop body
LE: loop exit
PB: predicated region body
PF: predicated region fallthrough
CT: control target
= control target key end

     0   :  { %v118_v0 = vmov 0   ;;  %s202_s4 = inlined_call_operand.vmem [shape: f32[16,1], index: 4, kind: input, shape index: {}]   ;;  %s203_s2 = inlined_call_operand.vmem [shape: f32[16,1], index: 2, kind: input, shape index: {}]   ;;  %s204_s3 = inlined_call_operand.vmem [shape: f32[16,1], index: 3, kind: input, shape index: {}]   ;;  %s205_s5 = inlined_call_operand.vmem [shape: f32[16,1], index: 5, kind: input, shape index: {}]   ;;  %s206_s0 = inlined_call_operand.vmem [shape: bf16[16,256], index: 0, kind: input, shape index: {}]   ;;  %s207_s1 = inlined_call_operand.vmem [shape: bf16[16,256], index: 1, kind: input, shape index: {}]   ;;  %s208_s6 = inlined_call_operand.vmem [shape: f32[16,256], index: 6, kind: output, shape index: {}]  }
   0x1   :  { %117 = vset.pattern.permute.xlu1 %v118_v0  ;;  %116 = vset.pattern.permute.xlu0 %v118_v0  ;;  %v67_v1 = vld [vmem:[%s202_s4] sm:$0xff]  ;;  %v68_v3 = vld [vmem:[%s202_s4 + $0x8] sm:$0xff] }
   0x2   :  { %v29_v2 = vld [vmem:[%s203_s2] sm:$0xff]  ;;  %71 = vperm.xlu1 %117, %v67_v1   ;;  %v30_v4 = vld [vmem:[%s203_s2 + $0x8] sm:$0xff] }
   0x3   :  { %33 = vperm.xlu0 %116, %v29_v2   ;;  %v46_v5 = vld [vmem:[%s204_s3 + $0x8] sm:$0xff]  ;;  %v45_v6 = vld [vmem:[%s204_s3] sm:$0xff] }
   0x4   :  { %v84_v7 = vld [vmem:[%s205_s5 + $0x8] sm:$0xff]  ;;  %v83_v8 = vld [vmem:[%s205_s5] sm:$0xff] }
   0x5   :  { %v23_v11 = vld [vmem:[%s206_s0] sm:$0xff]  ;;  %v24_v12 = vld [vmem:[%s206_s0 + $0x8] sm:$0xff] }
   0x6   :  { %76 = vperm.xlu1 %117, %v68_v3   ;;  %v61_v13 = vld [vmem:[%s207_s1] sm:$0xff]  ;;  %v62_v15 = vld [vmem:[%s207_s1 + $0x8] sm:$0xff]  ;;  %v25_v17 = vunpack.c.l.bf16 %v23_v11  ;;  %v26_v18 = vunpack.c.h.bf16 %v23_v11  ;;  %v27_v19 = vunpack.c.l.bf16 %v24_v12  ;;  %v28_v20 = vunpack.c.h.bf16 %v24_v12 }
   0x7   :  { %38 = vperm.xlu0 %116, %v30_v4   ;;  %v63_v21 = vunpack.c.l.bf16 %v61_v13  ;;  %v64_v22 = vunpack.c.h.bf16 %v61_v13  ;;  %v65_v23 = vunpack.c.l.bf16 %v62_v15  ;;  %v66_v24 = vunpack.c.h.bf16 %v62_v15 }
   0xa   :  { %54 = vperm.xlu1 %117, %v46_v5  }
   0xb   :  { %49 = vperm.xlu0 %116, %v45_v6  }
   0xe   :  { %92 = vperm.xlu1 %117, %v84_v7  }
   0xf   :  { %87 = vperm.xlu0 %116, %v83_v8  }
  0x81   :  { %v72_v9 = vpop.permute.xlu1 %71 }
  0x82   :  { %v34_v10 = vpop.permute.xlu0 %33  ;;  %v79_v31 = vmul.f32 %v72_v9, %v63_v21  ;;  %v80_v32 = vmul.f32 %v72_v9, %v64_v22 }
  0x83   :  { %v41_v27 = vmul.f32 %v34_v10, %v25_v17  ;;  %v42_v28 = vmul.f32 %v34_v10, %v26_v18 }
  0x85   :  { %v77_v14 = vpop.permute.xlu1 %76 }
  0x86   :  { %v39_v16 = vpop.permute.xlu0 %38  ;;  %v81_v33 = vmul.f32 %v77_v14, %v65_v23  ;;  %v82_v34 = vmul.f32 %v77_v14, %v66_v24 }
  0x87   :  { %v43_v29 = vmul.f32 %v39_v16, %v27_v19  ;;  %v44_v30 = vmul.f32 %v39_v16, %v28_v20 }
  0x89   :  { %v55_v25 = vpop.permute.xlu1 %54 }
  0x8a   :  { %v50_v26 = vpop.permute.xlu0 %49  ;;  %v59_v35 = vadd.f32 %v55_v25, %v43_v29  ;;  %v60_v36 = vadd.f32 %v55_v25, %v44_v30 }
  0x8b   :  { %v57_v37 = vadd.f32 %v50_v26, %v41_v27  ;;  %v58_v38 = vadd.f32 %v50_v26, %v42_v28 }
  0x8d   :  { %v93_v39 = vpop.permute.xlu1 %92 }
  0x8e   :  { %v88_v40 = vpop.permute.xlu0 %87  ;;  %v97_v41 = vadd.f32 %v93_v39, %v81_v33  ;;  %v98_v42 = vadd.f32 %v93_v39, %v82_v34 }
  0x8f   :  { %v95_v43 = vadd.f32 %v88_v40, %v79_v31  ;;  %v96_v44 = vadd.f32 %v88_v40, %v80_v32 }
  0x90   :  { %v101_v45 = vadd.f32 %v97_v41, %v59_v35  ;;  %v102_v46 = vadd.f32 %v98_v42, %v60_v36 }
  0x91   :  { %v99_v47 = vadd.f32 %v95_v43, %v57_v37  ;;  %v100_v48 = vadd.f32 %v96_v44, %v58_v38 }
  0x92   :  { %v105_v49 = vmax.f32 %v101_v45, 0.0  ;;  %v106_v50 = vmax.f32 %v102_v46, 0.0 }
  0x93   :  { %v103_v51 = vmax.f32 %v99_v47, 0.0  ;;  %v104_v52 = vmax.f32 %v100_v48, 0.0 }
  0x94   :  { %109 = vst [vmem:[%s208_s6 + $0x10] sm:$0xff] %v105_v49  ;;  %110 = vst [vmem:[%s208_s6 + $0x18] sm:$0xff] %v106_v50 }
  0x95   :  { %107 = vst [vmem:[%s208_s6] sm:$0xff] %v103_v51  ;;  %108 = vst [vmem:[%s208_s6 + $0x8] sm:$0xff] %v104_v52 }

// kernel: resblock_tier2_forward.4
= control target key start
LH: loop header
LB: loop body
LE: loop exit
PB: predicated region body
PF: predicated region fallthrough
CT: control target
= control target key end

     0   :  { %s1047_s0 = inlined_call_operand.vmem [shape: bf16[16,256], index: 0, kind: input, shape index: {}, may-alias: {0,1,2}]   ;;  %s1048_s1 = inlined_call_operand.vmem [shape: bf16[16,256], index: 1, kind: input, shape index: {}, may-alias: {0,1,2}]   ;;  %s1049_s2 = inlined_call_operand.vmem [shape: bf16[16,256], index: 2, kind: input, shape index: {}, may-alias: {0,1,2}]   ;;  %s1050_s3 = inlined_call_operand.vmem [shape: f32[1,256], index: 3, kind: input, shape index: {}, may-alias: {3,4,5}]   ;;  %s1051_s4 = inlined_call_operand.vmem [shape: f32[1,256], index: 4, kind: input, shape index: {}, may-alias: {3,4,5}]   ;;  %s1052_s5 = inlined_call_operand.vmem [shape: f32[1,256], index: 5, kind: input, shape index: {}, may-alias: {3,4,5}]   ;;  %s1053_s6 = inlined_call_operand.vmem [shape: bf16[16,144], index: 6, kind: input, shape index: {}]   ;;  %s1054_s7 = inlined_call_operand.vmem [shape: f32[16,1], index: 7, kind: input, shape index: {}]   ;;  %s1055_s8 = inlined_call_operand.vmem [shape: f32[16,1], index: 8, kind: input, shape index: {}]   ;;  %s1056_s9 = inlined_call_operand.vmem [shape: bf16[16,256], index: 9, kind: input, shape index: {}]   ;;  %s1057_s10 = inlined_call_operand.vmem [shape: bf16[16,16], index: 10, kind: input, shape index: {}]   ;;  %s1058_s11 = inlined_call_operand.vmem [shape: bf16[16,256], index: 11, kind: output, shape index: {0}]   ;;  %s1059_s12 = inlined_call_operand.vmem [shape: f32[1,16,1], index: 12, kind: output, shape index: {1}]   ;;  %s1060_s13 = inlined_call_operand.vmem [shape: f32[1,16,1], index: 13, kind: output, shape index: {2}]   ;;  %s1061_s14 = inlined_call_operand.vmem [shape: bf16[16,256], index: 14, kind: output, shape index: {3}]   ;;  %s1062_s15 = inlined_call_operand.vmem [shape: f32[1,16,1], index: 15, kind: output, shape index: {4}]   ;;  %s1063_s16 = inlined_call_operand.vmem [shape: f32[1,16,1], index: 16, kind: output, shape index: {5}]  }
   0x1   :  { %1065 = sst [smem:[#allocation4_spill]] %s1047_s0 }
   0x2   :  { %v283_v0 = vld [vmem:[%s1055_s8] sm:$0xff]  ;;  %v793_v2 = vmov 0   ;;  %s1066_s27 = sld [smem:[#allocation4_spill]]  ;;  %v284_v5 = vld [vmem:[%s1055_s8 + $0x8] sm:$0xff]  ;;  %v245_v9 = vlaneseq  ;;  %s794_s26 = smov 127   ;;  %vm348_vm0 = vcmask 1039360  }
   0x3   :  { %v263_v1 = vld [vmem:[%s1054_s7] sm:$0xff]  ;;  %780 = vset.pattern.permute.xlu1 %v793_v2  ;;  %779 = vset.pattern.permute.xlu0 %v793_v2  ;;  %v746_v7 = vld [vmem:[%s1049_s2 + $0xc] sm:$0xf]  ;;  %s797_s28 = smov 117   ;;  %s798_s0 = smov 116   ;;  %vm357_vm1 = vcmask 1031168  }
   0x4   :  { %287 = vperm.xlu1 %780, %v283_v0   ;;  %267 = vperm.xlu0 %779, %v263_v1   ;;  %v745_v6 = vld [vmem:[%s1049_s2 + $0x4] sm:$0xf]  ;;  %v264_v8 = vld [vmem:[%s1054_s7 + $0x8] sm:$0xff]  ;;  %101 = vst [vmem:[#allocation3 + $0x4] sm:$0xf] %v746_v7  ;;  %v246_v13 = vshrl.u32 %v245_v9, 7 }
   0x5   :  { %99 = vst [vmem:[#allocation3] sm:$0xf] %v745_v6  ;;  %654 = vmatprep.mubr.bf16.mxu1 %v793_v2  ;;  %v782_v10 = vld [vmem:[%s1048_s1] ss:$8 sps:$4 sm:$0xff]   ;;  %v784_v11 = vld [vmem:[%s1048_s1 + $0x4] ss:$8 sps:$4 sm:$0xff]  }
   0x6   :  { %v256_v14 = vunpack.c.l.bf16 %v782_v10  ;;  %v257_v15 = vunpack.c.l.bf16 %v784_v11  ;;  %v247_v16 = vsub.s32 0, %v246_v13  ;;  %v251_v17 = vsub.s32 1, %v246_v13  ;;  %v213_v20 = vld [vmem:[%s1051_s4] sm:$0x3]  ;;  %s799_s17 = smov 108   ;;  %s800_s18 = smov 107  }
   0x7   :  { %v260_v25 = vunpack.c.h.bf16 %v782_v10  ;;  %v261_v26 = vunpack.c.h.bf16 %v784_v11  ;;  %v752_v53 = vld [vmem:[%s1050_s3] ss:$0 sm:$0xff]  ;;  %s796_s3 = smov 118   ;;  %s801_s19 = smov 106   ;;  %vm366_vm2 = vcmask 965632   ;;  %vm373_vm3 = vcmask 957440  }
   0x8   :  { %v45_v3 = vld [vmem:[%s1066_s27] sm:$0xf]  ;;  %v47_v4 = vld [vmem:[%s1066_s27 + $0x8] sm:$0xf]  ;;  %292 = vperm.xlu1 %780, %v284_v5   ;;  %272 = vperm.xlu0 %779, %v264_v8   ;;  %v921_v27 = vrot.slane %v213_v20, %v247_v16  ;;  %v923_v28 = vrot.slane %v213_v20, %v251_v17  ;;  %s795_s27 = smov 126   ;;  %vm382_vm4 = vcmask 949248  }
   0x9   :  { %46 = vst [vmem:[#allocation2] sm:$0xf] %v45_v3  ;;  %48 = vst [vmem:[#allocation2 + $0x4] sm:$0xf] %v47_v4  ;;  %v753_v4 = vld [vmem:[%s1052_s5 + $0x1] ss:$0 sm:$0xff] }
   0xa   :  { %v318_v38 = vrot.slane %v921_v27, %v247_v16  ;;  %v322_v39 = vrot.slane %v923_v28, %v247_v16  ;;  %s802_s5 = smov 11   ;;  %vm514_vm5 = vcmask 130048   ;;  %vm391_vm6 = vcmask 883712  }
   0xb   :  { %vm477_vm7 = vcmask 89088   ;;  %vm400_vm8 = vcmask 875520   ;;  %vm409_vm9 = vcmask 867328   ;;  %vm585_vm10 = vcmask 7168  }
   0xc   :  { %v785_v57 = vld [vmem:[#allocation3] sm:$0xff]  }
   0xd   :  { %v262_v59 = vunpack.c.h.bf16 %v785_v57  ;;  %v258_v61 = vunpack.c.l.bf16 %v785_v57 }
  0x10   :  { %v781_v12 = vld [vmem:[#allocation2] sm:$0xff]  }
  0x11   :  { %v255_v18 = vunpack.c.l.bf16 %v781_v12  ;;  %v259_v24 = vunpack.c.h.bf16 %v781_v12 }
  0x83   :  { %v268_v19 = vpop.permute.xlu0 %267  ;;  %v288_v21 = vpop.permute.xlu1 %287 }
  0x84   :  { %v276_v22 = vmul.f32 %v268_v19, %v256_v14  ;;  %v277_v23 = vmul.f32 %v268_v19, %v257_v15  ;;  %v275_v29 = vmul.f32 %v268_v19, %v255_v18  ;;  %v278_v63 = vmul.f32 %v268_v19, %v258_v61 }
  0x86   :  { %v296_v30 = vadd.f32 %v288_v21, %v276_v22  ;;  %v297_v31 = vadd.f32 %v288_v21, %v277_v23  ;;  %v295_v36 = vadd.f32 %v288_v21, %v275_v29  ;;  %v298_v1 = vadd.f32 %v288_v21, %v278_v63 }
  0x87   :  { %v273_v32 = vpop.permute.xlu0 %272  ;;  %v293_v40 = vpop.permute.xlu1 %292 }
  0x88   :  { %v279_v33 = vmul.f32 %v273_v32, %v259_v24  ;;  %v280_v34 = vmul.f32 %v273_v32, %v260_v25  ;;  %v281_v35 = vmul.f32 %v273_v32, %v261_v26  ;;  %v304_v37 = vmax.f32 %v296_v30, 0.0 }
  0x89   :  { %v305_v41 = vmax.f32 %v297_v31, 0.0  ;;  %v303_v48 = vmax.f32 %v295_v36, 0.0  ;;  %v282_v62 = vmul.f32 %v273_v32, %v262_v59  ;;  %v306_v3 = vmax.f32 %v298_v1, 0.0  ;;  %v788_v36 = vld [vmem:[%s1056_s9] ss:$8 sps:$4 sm:$0xff]  }
  0x8a   :  { %v299_v42 = vadd.f32 %v293_v40, %v279_v33  ;;  %v300_v43 = vadd.f32 %v293_v40, %v280_v34  ;;  %v301_v44 = vadd.f32 %v293_v40, %v281_v35  ;;  %v328_v49 = vmul.f32 %v318_v38, %v304_v37  ;;  %v786_v35 = vld [vmem:[%s1056_s9 + $0x4] ss:$8 sps:$4 sm:$0xff]  }
  0x8b   :  { %v329_v50 = vmul.f32 %v322_v39, %v305_v41  ;;  %v327_v58 = vmul.f32 %v752_v53, %v303_v48  ;;  %v302_v0 = vadd.f32 %v293_v40, %v282_v62  ;;  %v330_v6 = vmul.f32 %v753_v4, %v306_v3  ;;  %622 = vmatprep.subr.bf16.mxu1 %v786_v35  ;;  %v789_v41 = vld [vmem:[%s1057_s10] sm:$0xff]  }
  0x8c   :  { %v307_v45 = vmax.f32 %v299_v42, 0.0  ;;  %v308_v46 = vmax.f32 %v300_v43, 0.0  ;;  %v309_v47 = vmax.f32 %v301_v44, 0.0  ;;  %623 = vmatpush1.bf16.msra.mxu1 %v788_v36  ;;  %v790_v35 = vld [vmem:[%s1053_s6] ss:$8 sps:$4 sm:$0xff]  }
  0x8d   :  { %v310_v2 = vmax.f32 %v302_v0, 0.0 }
  0x8e   :  { %v332_v51 = vmul.f32 %v318_v38, %v308_v46  ;;  %v333_v52 = vmul.f32 %v322_v39, %v309_v47  ;;  %v331_v56 = vmul.f32 %v752_v53, %v307_v45 }
  0x8f   :  { %v334_v5 = vmul.f32 %v753_v4, %v310_v2  ;;  %762 = vmatmul.mubr.msk.bf16.vlgmr.msra.gmra.mrb[0].mxu1 %vm514_vm5, %v789_v41 }
  0x90   :  { %v336_v54 = vpack.c.bf16 %v332_v51, %v328_v49  ;;  %v337_v55 = vpack.c.bf16 %v333_v52, %v329_v50  ;;  %v335_v60 = vpack.c.bf16 %v331_v56, %v327_v58  ;;  %v792_v51 = vld [vmem:[%s1053_s6 + $0x4] ss:$8 sps:$4 sm:$0xff]  }
  0x91   :  { %v338_v7 = vpack.c.bf16 %v334_v5, %v330_v6  ;;  %756 = vmatprep.mubr.msk.bf16.mxu0 %vm514_vm5, %v792_v51 }
  0x92   :  { %346 = vrot.lane.b32.xlu1 %v337_v55, %s794_s26  ;;  %344 = vrot.lane.b32.xlu0 %v336_v54, %s794_s26 }
  0x96   :  { %353 = vrot.lane.b32.xlu1 %v336_v54, %s795_s27  ;;  %342 = vrot.lane.b32.xlu0 %v335_v60, %s794_s26 }
  0x9a   :  { %351 = vrot.lane.b32.xlu1 %v335_v60, %s795_s27  ;;  %355 = vrot.lane.b32.xlu0 %v337_v55, %s795_s27 }
  0x9e   :  { %364 = vrot.lane.b32.xlu1 %v337_v55, %s796_s3  ;;  %362 = vrot.lane.b32.xlu0 %v336_v54, %s796_s3 }
  0xa2   :  { %369 = vrot.lane.b32.xlu1 %v336_v54, %s797_s28  ;;  %360 = vrot.lane.b32.xlu0 %v335_v60, %s796_s3 }
  0xa6   :  { %376 = vrot.lane.b32.xlu1 %v336_v54, %s798_s0  ;;  %371 = vrot.lane.b32.xlu0 %v337_v55, %s797_s28 }
  0xaa   :  { %380 = vrot.lane.b32.xlu1 %v338_v7, %s798_s0  ;;  %378 = vrot.lane.b32.xlu0 %v337_v55, %s798_s0 }
  0xae   :  { %387 = vrot.lane.b32.xlu1 %v337_v55, %s799_s17  ;;  %385 = vrot.lane.b32.xlu0 %v336_v54, %s799_s17 }
  0xb2   :  { %394 = vrot.lane.b32.xlu1 %v336_v54, %s800_s18  ;;  %389 = vrot.lane.b32.xlu0 %v338_v7, %s799_s17 }
  0xb6   :  { %398 = vrot.lane.b32.xlu1 %v338_v7, %s800_s18  ;;  %396 = vrot.lane.b32.xlu0 %v337_v55, %s800_s18 }
  0xba   :  { %405 = vrot.lane.b32.xlu1 %v337_v55, %s801_s19  ;;  %403 = vrot.lane.b32.xlu0 %v336_v54, %s801_s19 }
  0xbe   :  { %425 = vrot.lane.b32.xlu1 %v336_v54, %s802_s5  ;;  %407 = vrot.lane.b32.xlu0 %v338_v7, %s801_s19 }
  0xc2   :  { %423 = vrot.lane.b32.xlu1 %v335_v60, %s802_s5  ;;  %427 = vrot.lane.b32.xlu0 %v337_v55, %s802_s5 }
 0x104   :  { %v347_v8 = vpop.permute.xlu1 %346  ;;  %v345_v9 = vpop.permute.xlu0 %344 }
 0x105   :  { %433 = vrot.lane.b32.xlu1 %v347_v8, %s802_s5  ;;  %v350_v24 = vsel %vm348_vm0, %v345_v9, %v347_v8 }
 0x108   :  { %v354_v10 = vpop.permute.xlu1 %353  ;;  %v343_v11 = vpop.permute.xlu0 %342 }
 0x109   :  { %v349_v29 = vsel %vm348_vm0, %v343_v11, %v345_v9 }
 0x10c   :  { %v352_v12 = vpop.permute.xlu1 %351  ;;  %v356_v13 = vpop.permute.xlu0 %355 }
 0x10d   :  { %439 = vrot.lane.b32.xlu0 %v356_v13, %s802_s5  ;;  %v359_v30 = vsel %vm357_vm1, %v354_v10, %v356_v13  ;;  %v358_v34 = vsel %vm357_vm1, %v352_v12, %v354_v10 }
 0x110   :  { %v365_v14 = vpop.permute.xlu1 %364  ;;  %v363_v15 = vpop.permute.xlu0 %362 }
 0x111   :  { %445 = vrot.lane.b32.xlu1 %v365_v14, %s802_s5  ;;  %v368_v33 = vsel %vm366_vm2, %v363_v15, %v365_v14 }
 0x114   :  { %v370_v16 = vpop.permute.xlu1 %369  ;;  %v361_v17 = vpop.permute.xlu0 %360 }
 0x115   :  { %447 = vrot.lane.b32.xlu1 %v370_v16, %s802_s5  ;;  %v367_v39 = vsel %vm366_vm2, %v361_v17, %v363_v15 }
 0x118   :  { %v377_v18 = vpop.permute.xlu1 %376  ;;  %v372_v19 = vpop.permute.xlu0 %371 }
 0x119   :  { %451 = vrot.lane.b32.xlu0 %v372_v19, %s802_s5  ;;  %v374_v40 = vsel %vm373_vm3, %v370_v16, %v372_v19 }
 0x11c   :  { %v381_v20 = vpop.permute.xlu1 %380  ;;  %v379_v21 = vpop.permute.xlu0 %378 }
 0x11d   :  { %453 = vrot.lane.b32.xlu0 %v377_v18, %s802_s5  ;;  %v384_v44 = vsel %vm382_vm4, %v379_v21, %v381_v20  ;;  %v383_v47 = vsel %vm382_vm4, %v377_v18, %v379_v21 }
 0x120   :  { %v388_v22 = vpop.permute.xlu1 %387  ;;  %v386_v23 = vpop.permute.xlu0 %385 }
 0x121   :  { %431 = vrot.lane.b32.xlu0 %v350_v24, %s802_s5  ;;  %459 = vrot.lane.b32.xlu1 %v386_v23, %s802_s5  ;;  %v392_v48 = vsel %vm391_vm6, %v386_v23, %v388_v22 }
 0x124   :  { %v395_v25 = vpop.permute.xlu1 %394  ;;  %v390_v26 = vpop.permute.xlu0 %389 }
 0x125   :  { %429 = vrot.lane.b32.xlu0 %v349_v29, %s802_s5  ;;  %437 = vrot.lane.b32.xlu1 %v359_v30, %s802_s5  ;;  %v393_v52 = vsel %vm391_vm6, %v388_v22, %v390_v26 }
 0x128   :  { %v399_v31 = vpop.permute.xlu1 %398  ;;  %v397_v32 = vpop.permute.xlu0 %396 }
 0x129   :  { %443 = vrot.lane.b32.xlu0 %v368_v33, %s802_s5  ;;  %435 = vrot.lane.b32.xlu1 %v358_v34, %s802_s5  ;;  %v402_v53 = vsel %vm400_vm8, %v397_v32, %v399_v31  ;;  %v401_v54 = vsel %vm400_vm8, %v395_v25, %v397_v32 }
 0x12c   :  { %v406_v37 = vpop.permute.xlu1 %405  ;;  %v404_v38 = vpop.permute.xlu0 %403 }
 0x12d   :  { %441 = vrot.lane.b32.xlu0 %v367_v39, %s802_s5  ;;  %449 = vrot.lane.b32.xlu1 %v374_v40, %s802_s5  ;;  %v410_v55 = vsel %vm409_vm9, %v404_v38, %v406_v37 }
 0x130   :  { %v426_v42 = vpop.permute.xlu1 %425  ;;  %v408_v43 = vpop.permute.xlu0 %407 }
 0x131   :  { %465 = vrot.lane.b32.xlu0 %v395_v25, %s802_s5  ;;  %457 = vrot.lane.b32.xlu1 %v384_v44, %s802_s5  ;;  %v411_v56 = vsel %vm409_vm9, %v406_v37, %v408_v43 }
 0x134   :  { %v424_v45 = vpop.permute.xlu1 %423  ;;  %v428_v46 = vpop.permute.xlu0 %427 }
 0x135   :  { %455 = vrot.lane.b32.xlu0 %v383_v47, %s802_s5  ;;  %461 = vrot.lane.b32.xlu1 %v392_v48, %s802_s5  ;;  %v479_v49 = vsel %vm477_vm7, %v426_v42, %v428_v46  ;;  %v478_v50 = vsel %vm477_vm7, %v424_v45, %v426_v42 }
 0x136   :  { %518 = vmatprep.subr.bf16.mxu0 %v479_v49 }
 0x137   :  { %519 = vmatpush1.bf16.msra.mxu0 %v478_v50 }
 0x139   :  { %463 = vrot.lane.b32.xlu0 %v393_v52, %s802_s5  ;;  %469 = vrot.lane.b32.xlu1 %v402_v53, %s802_s5 }
 0x13d   :  { %467 = vrot.lane.b32.xlu0 %v401_v54, %s802_s5  ;;  %473 = vrot.lane.b32.xlu1 %v410_v55, %s802_s5 }
 0x141   :  { %471 = vrot.lane.b32.xlu1 %v404_v38, %s802_s5  ;;  %475 = vrot.lane.b32.xlu0 %v411_v56, %s802_s5 }
 0x162   :  { %v656_v36 = vpop.f32.mrb[0].mxu1 }
 0x163   :  { %v658_v37 = vpop.f32.mrb[1].mxu1  ;;  %v679_v40 = vmul.f32 %v656_v36, %v921_v27 }
 0x164   :  { %v767_v38 = vpack.c.bf16 %v658_v37, %v656_v36  ;;  %v660_v39 = vpop.f32.mrb[2].mxu1  ;;  %v680_v41 = vmul.f32 %v658_v37, %v923_v28 }
 0x165   :  { %v662_v42 = vpop.f32.mrb[3].mxu1  ;;  %v681_v43 = vmul.f32 %v660_v39, %v921_v27  ;;  %v691_v49 = vmul.f32 %v679_v40, %v656_v36 }
 0x166   :  { %677 = vst [vmem:[%s1061_s14] sm:$0xff] %v767_v38  ;;  %v768_v44 = vpack.c.bf16 %v662_v42, %v660_v39  ;;  %v682_v45 = vmul.f32 %v662_v42, %v923_v28  ;;  %v683_v46 = vadd.f32 %v680_v41, %v679_v40  ;;  %v692_v50 = vmul.f32 %v680_v41, %v658_v37 }
 0x167   :  { %v693_v51 = vmul.f32 %v681_v43, %v660_v39 }
 0x168   :  { %678 = vst [vmem:[%s1061_s14 + $0x8] sm:$0xff] %v768_v44  ;;  %v694_v47 = vmul.f32 %v682_v45, %v662_v42  ;;  %684 = vadd.xlane.f32.xlu1 %v683_v46  ;;  %v686_v48 = vadd.f32 %v682_v45, %v681_v43  ;;  %v695_v52 = vadd.f32 %v692_v50, %v691_v49 }
 0x16a   :  { %687 = vadd.xlane.f32.xlu0 %v686_v48  ;;  %v698_v53 = vadd.f32 %v694_v47, %v693_v51 }
 0x177   :  { %v434_v57 = vpop.permute.xlu1 %433 }
 0x17f   :  { %v440_v58 = vpop.permute.xlu0 %439 }
 0x183   :  { %v446_v59 = vpop.permute.xlu1 %445 }
 0x187   :  { %v448_v61 = vpop.permute.xlu1 %447 }
 0x18b   :  { %v452_v60 = vpop.permute.xlu0 %451 }
 0x18f   :  { %v454_v62 = vpop.permute.xlu0 %453 }
 0x193   :  { %v460_v63 = vpop.permute.xlu1 %459  ;;  %v432_v0 = vpop.permute.xlu0 %431 }
 0x194   :  { %v481_v1 = vsel %vm477_vm7, %v432_v0, %v434_v57 }
 0x195   :  { %520 = vmatprep.subr.bf16.mxu0 %v481_v1 }
 0x197   :  { %v438_v2 = vpop.permute.xlu1 %437  ;;  %v430_v3 = vpop.permute.xlu0 %429 }
 0x198   :  { %v480_v4 = vsel %vm477_vm7, %v430_v3, %v432_v0  ;;  %v483_v5 = vsel %vm477_vm7, %v438_v2, %v440_v58 }
 0x199   :  { %521 = vmatpush1.bf16.msra.mxu0 %v480_v4 }
 0x19a   :  { %522 = vmatprep.subr.bf16.mxu0 %v483_v5 }
 0x19b   :  { %v436_v6 = vpop.permute.xlu1 %435  ;;  %v444_v7 = vpop.permute.xlu0 %443 }
 0x19c   :  { %v482_v8 = vsel %vm477_vm7, %v436_v6, %v438_v2  ;;  %v485_v9 = vsel %vm477_vm7, %v444_v7, %v446_v59 }
 0x19d   :  { %523 = vmatpush1.bf16.msra.mxu0 %v482_v8 }
 0x19e   :  { %524 = vmatprep.subr.bf16.mxu0 %v485_v9 }
 0x19f   :  { %v450_v10 = vpop.permute.xlu1 %449  ;;  %v442_v11 = vpop.permute.xlu0 %441 }
 0x1a0   :  { %v484_v12 = vsel %vm477_vm7, %v442_v11, %v444_v7  ;;  %v487_v13 = vsel %vm477_vm7, %v450_v10, %v452_v60  ;;  %v486_v16 = vsel %vm477_vm7, %v448_v61, %v450_v10 }
 0x1a1   :  { %525 = vmatpush1.bf16.msra.mxu0 %v484_v12 }
 0x1a2   :  { %526 = vmatprep.subr.bf16.mxu0 %v487_v13 }
 0x1a3   :  { %v458_v14 = vpop.permute.xlu1 %457  ;;  %v466_v15 = vpop.permute.xlu0 %465 }
 0x1a5   :  { %527 = vmatpush1.bf16.msra.mxu0 %v486_v16 }
 0x1a7   :  { %v462_v17 = vpop.permute.xlu1 %461  ;;  %v456_v18 = vpop.permute.xlu0 %455 }
 0x1a8   :  { %v489_v19 = vsel %vm477_vm7, %v456_v18, %v458_v14  ;;  %v488_v20 = vsel %vm477_vm7, %v454_v62, %v456_v18  ;;  %v490_v24 = vsel %vm477_vm7, %v460_v63, %v462_v17 }
 0x1a9   :  { %528 = vmatprep.subr.bf16.mxu0 %v489_v19 }
 0x1aa   :  { %529 = vmatpush1.bf16.msra.mxu0 %v488_v20 }
 0x1ab   :  { %v470_v21 = vpop.permute.xlu1 %469  ;;  %v464_v22 = vpop.permute.xlu0 %463 }
 0x1ac   :  { %v491_v23 = vsel %vm477_vm7, %v462_v17, %v464_v22 }
 0x1ad   :  { %530 = vmatprep.subr.bf16.mxu0 %v491_v23 }
 0x1ae   :  { %531 = vmatpush1.bf16.msra.mxu0 %v490_v24 }
 0x1af   :  { %v474_v25 = vpop.permute.xlu1 %473  ;;  %v468_v26 = vpop.permute.xlu0 %467 }
 0x1b0   :  { %v493_v29 = vsel %vm477_vm7, %v468_v26, %v470_v21  ;;  %v492_v30 = vsel %vm477_vm7, %v466_v15, %v468_v26 }
 0x1b1   :  { %532 = vmatprep.subr.bf16.mxu0 %v493_v29 }
 0x1b2   :  { %533 = vmatpush1.bf16.msra.mxu0 %v492_v30 }
 0x1b3   :  { %v472_v31 = vpop.permute.xlu1 %471  ;;  %v476_v32 = vpop.permute.xlu0 %475 }
 0x1b4   :  { %v495_v33 = vsel %vm477_vm7, %v474_v25, %v476_v32  ;;  %v494_v34 = vsel %vm477_vm7, %v472_v31, %v474_v25 }
 0x1b5   :  { %534 = vmatprep.subr.bf16.mxu0 %v495_v33 }
 0x1b6   :  { %535 = vmatpush1.bf16.msra.mxu0 %v494_v34 }
 0x1b9   :  { %551 = vmatmul.mubr.bf16.vlgmr.msra.gmra.mrb[0].mxu0 %v790_v35 }
 0x1f5   :  { %v685_v7 = vpop.xlane.xlu1 %684 }
 0x1f6   :  { %689 = vst.msk [vmem:[%s1062_s15] sm:$0xff] %vm585_vm10, %v685_v7 }
 0x28c   :  { %v552_v54 = vpop.f32.mrb[0].mxu0 }
 0x28d   :  { %v554_v55 = vpop.f32.mrb[1].mxu0  ;;  %v575_v56 = vmul.f32 %v552_v54, %v921_v27 }
 0x28e   :  { %v765_v57 = vpack.c.bf16 %v554_v55, %v552_v54  ;;  %v556_v58 = vpop.f32.mrb[2].mxu0  ;;  %v576_v59 = vmul.f32 %v554_v55, %v923_v28 }
 0x28f   :  { %v558_v60 = vpop.f32.mrb[3].mxu0  ;;  %v577_v61 = vmul.f32 %v556_v58, %v921_v27  ;;  %v588_v62 = vmul.f32 %v575_v56, %v552_v54 }
 0x290   :  { %573 = vst [vmem:[%s1058_s11] sm:$0xff] %v765_v57  ;;  %v766_v63 = vpack.c.bf16 %v558_v60, %v556_v58  ;;  %v578_v0 = vmul.f32 %v558_v60, %v923_v28  ;;  %v579_v1 = vadd.f32 %v576_v59, %v575_v56  ;;  %v589_v2 = vmul.f32 %v576_v59, %v554_v55  ;;  %v688_v28 = vpop.xlane.xlu0 %687 }
 0x291   :  { %v590_v3 = vmul.f32 %v577_v61, %v556_v58  ;;  %690 = vst.msk [vmem:[%s1062_s15 + $0x8] sm:$0xff] %vm585_vm10, %v688_v28 }
 0x292   :  { %574 = vst [vmem:[%s1058_s11 + $0x8] sm:$0xff] %v766_v63  ;;  %v591_v4 = vmul.f32 %v578_v0, %v558_v60  ;;  %580 = vadd.xlane.f32.xlu0 %v579_v1  ;;  %v582_v5 = vadd.f32 %v578_v0, %v577_v61  ;;  %v592_v6 = vadd.f32 %v589_v2, %v588_v62 }
 0x294   :  { %583 = vadd.xlane.f32.xlu1 %v582_v5  ;;  %v595_v27 = vadd.f32 %v591_v4, %v590_v3 }
 0x296   :  { %593 = vadd.xlane.f32.xlu0 %v592_v6 }
 0x298   :  { %696 = vadd.xlane.f32.xlu1 %v695_v52 }
 0x29a   :  { %596 = vadd.xlane.f32.xlu0 %v595_v27 }
 0x29e   :  { %699 = vadd.xlane.f32.xlu0 %v698_v53 }
 0x31f   :  { %v581_v8 = vpop.xlane.xlu0 %580 }
 0x320   :  { %586 = vst.msk [vmem:[%s1059_s12] sm:$0xff] %vm585_vm10, %v581_v8 }
 0x321   :  { %v584_v9 = vpop.xlane.xlu1 %583 }
 0x322   :  { %587 = vst.msk [vmem:[%s1059_s12 + $0x8] sm:$0xff] %vm585_vm10, %v584_v9 }
 0x323   :  { %v594_v10 = vpop.xlane.xlu0 %593 }
 0x324   :  { %598 = vst.msk [vmem:[%s1060_s13] sm:$0xff] %vm585_vm10, %v594_v10 }
 0x325   :  { %v697_v11 = vpop.xlane.xlu1 %696 }
 0x326   :  { %701 = vst.msk [vmem:[%s1063_s16] sm:$0xff] %vm585_vm10, %v697_v11 }
 0x327   :  { %v597_v12 = vpop.xlane.xlu0 %596 }
 0x328   :  { %599 = vst.msk [vmem:[%s1060_s13 + $0x8] sm:$0xff] %vm585_vm10, %v597_v12 }
 0x32b   :  { %v700_v13 = vpop.xlane.xlu0 %699 }
 0x32c   :  { %702 = vst.msk [vmem:[%s1063_s16 + $0x8] sm:$0xff] %vm585_vm10, %v700_v13 }

</bundles_post_ra>
